<compile_context>
chip_gen: v7x
topology: tpu7x:2x2x1
jax: 0.10.0
libtpu: 0.0.40
codegen_flags: <defaults>
</compile_context>

<pallas_src>
import jax
import jax.numpy as jnp
import numpy as np
from jax.experimental import pallas as pl
from jax.experimental.pallas import tpu as pltpu

# ---------------- model dims --------------------------------------------------
C_IN = 4
H = W = 16
C_FEAT = 32            # repres_dim = base_model.classifier.in_features
N_CLASS = 10           # base_model.classifier.out_features
PROJ_DIM = 16          # proj_dim (use_proj_head=True)
HID = C_FEAT // 2      # l1 output width = 16
KH = KW = 3
WP = W + 2             # padded spatial width = 18
KIN = WP * C_IN        # flattened (w_pad, c) lane dim = 72
CONV_N = W * C_FEAT    # conv matmul output lanes = (w, c_out) = 512
OUT_PAD = 128          # lane-dense padded logits width


# ---------------- Pallas kernel: the entire MoonWrapper forward ---------------
def moon_kernel(x_ref, wband_ref, bconv_ref, m1_ref, b1_ref,
                wfold_ref, bfold_ref, out_ref):
    TB = x_ref.shape[0]

    # --- 3x3 conv as 3 banded matmuls over dh-shifted row slabs --------------
    # x_ref: (TB, 18, 72); wband_ref: (3, 72, 512) with the dw shift and the
    # output-w position folded into the (banded) weight columns.
    def slab(dh):
        return x_ref[:, dh:dh + H, :].reshape(TB * H, KIN)

    acc = jnp.dot(slab(0), wband_ref[0], preferred_element_type=jnp.float32)
    acc = acc + jnp.dot(slab(1), wband_ref[1], preferred_element_type=jnp.float32)
    acc = acc + jnp.dot(slab(2), wband_ref[2], preferred_element_type=jnp.float32)
    conv = jnp.maximum(acc + bconv_ref[...], 0.0)        # (TB*16, 512) = (b*h, w*cf)

    # --- GAP(w) fused with l1 via one matmul; GAP(h) = 16-row sublane sum ----
    a = jnp.dot(conv, m1_ref[...], preferred_element_type=jnp.float32)   # (TB*16, 16)
    a = a.reshape(TB, H, HID).sum(axis=1)                                # (TB, 16)
    h1 = jnp.maximum(a + b1_ref[...], 0.0)

    # --- l2 + classifier folded; lane-dense 128-wide output ------------------
    out = jnp.dot(h1, wfold_ref[...], preferred_element_type=jnp.float32) + bfold_ref[...]
    out_ref[...] = out.astype(out_ref.dtype)


# ---------------- host-side parameter folding ---------------------------------
def prepare_derived(params):
    """Fold / re-layout MoonWrapper params for the fused kernel (done once)."""
    wconv = np.asarray(params["wconv"], np.float32)            # (36, 32), row = (kh*3+kw)*4 + c
    w4 = wconv.reshape(KH, KW, C_IN, C_FEAT)

    # banded conv weight: wband[dh, (w+dw)*C_IN + c, w*C_FEAT + co] = W[dh, dw, c, co]
    wband = np.zeros((KH, KIN, CONV_N), np.float32)
    for dh in range(KH):
        for dw in range(KW):
            for w in range(W):
                wband[dh, (w + dw) * C_IN:(w + dw + 1) * C_IN,
                      w * C_FEAT:(w + 1) * C_FEAT] = w4[dh, dw]

    bconv_t = np.tile(np.asarray(params["bconv"], np.float32).reshape(-1), W).reshape(1, CONV_N)

    # GAP-over-w folded into l1: m1[w*32 + co, j] = w1[co, j] / (H*W)
    w1 = np.asarray(params["w1"], np.float32)
    m1 = np.tile(w1 / float(H * W), (W, 1))                    # (512, 16)

    # l2 + classifier folded exactly (no nonlinearity between them)
    w2 = np.asarray(params["w2"], np.float32)
    wc = np.asarray(params["wc"], np.float32)
    b2 = np.asarray(params["b2"], np.float32)
    bc = np.asarray(params["bc"], np.float32)
    wfold = np.zeros((HID, OUT_PAD), np.float32)
    wfold[:, :N_CLASS] = w2 @ wc
    bfold = np.zeros((1, OUT_PAD), np.float32)
    bfold[:, :N_CLASS] = b2 @ wc + bc

    return {
        "wband": jnp.asarray(wband),
        "bconv_t": jnp.asarray(bconv_t),
        "m1": jnp.asarray(m1),
        "b1": jnp.asarray(params["b1"], jnp.float32),          # (1, 16)
        "wfold": jnp.asarray(wfold),
        "bfold": jnp.asarray(bfold),
    }


# ---------------- glue: pad + batch-tiled pallas_call --------------------------
def moon_wrapper_forward(x_nchw, derived, tb=128):
    B = x_nchw.shape[0]
    x = jnp.transpose(x_nchw, (0, 2, 3, 1)).astype(jnp.float32)        # NHWC
    xpad = jnp.pad(x, ((0, 0), (1, 1), (1, 1), (0, 0)))                # (B, 18, 18, 4)
    xpad = xpad.reshape(B, WP, WP * C_IN)                              # (B, 18, 72)

    TB = min(tb, ((B + 7) // 8) * 8)                                   # batch tile (mult of 8)
    Bp = ((B + TB - 1) // TB) * TB
    if Bp != B:
        xpad = jnp.pad(xpad, ((0, Bp - B), (0, 0), (0, 0)))            # pad partial tile
    grid = (Bp // TB,)

    inv = lambda i: (0, 0)   # grid-invariant weights: DMA'd once, stay resident
    out = pl.pallas_call(
        moon_kernel,
        out_shape=jax.ShapeDtypeStruct((Bp, OUT_PAD), jnp.float32),
        grid_spec=pltpu.PrefetchScalarGridSpec(
            num_scalar_prefetch=0,
            grid=grid,
            in_specs=[
                pl.BlockSpec((TB, WP, WP * C_IN), lambda i: (i, 0, 0)),   # x tile
                pl.BlockSpec((KH, KIN, CONV_N), lambda i: (0, 0, 0)),     # banded conv W
                pl.BlockSpec((1, CONV_N), inv),                           # conv bias (tiled)
                pl.BlockSpec((CONV_N, HID), inv),                         # GAP(w)+l1 fused W
                pl.BlockSpec((1, HID), inv),                              # b1
                pl.BlockSpec((HID, OUT_PAD), inv),                        # w2@wc (padded)
                pl.BlockSpec((1, OUT_PAD), inv),                          # b2@wc+bc (padded)
            ],
            out_specs=pl.BlockSpec((TB, OUT_PAD), lambda i: (i, 0)),
        ),
        compiler_params=pltpu.CompilerParams(
            dimension_semantics=("parallel",)),
    )(xpad, derived["wband"], derived["bconv_t"], derived["m1"],
      derived["b1"], derived["wfold"], derived["bfold"])
    return out[:B, :N_CLASS]


# ---------------- deterministic parameter init ---------------------------------
def init_params(key):
    ks = jax.random.split(key, 8)
    s = 0.1
    return {
        # conv weight stored im2col-style: row = (kh*3+kw)*C_in + c_in
        "wconv": s * jax.random.normal(ks[0], (KH * KW * C_IN, C_FEAT), jnp.float32),
        "bconv": s * jax.random.normal(ks[1], (1, C_FEAT), jnp.float32),
        "w1":    s * jax.random.normal(ks[2], (C_FEAT, HID), jnp.float32),
        "b1":    s * jax.random.normal(ks[3], (1, HID), jnp.float32),
        "w2":    s * jax.random.normal(ks[4], (HID, PROJ_DIM), jnp.float32),
        "b2":    s * jax.random.normal(ks[5], (1, PROJ_DIM), jnp.float32),
        "wc":    s * jax.random.normal(ks[6], (PROJ_DIM, N_CLASS), jnp.float32),
        "bc":    s * jax.random.normal(ks[7], (1, N_CLASS), jnp.float32),
    }


# ---------------- pure-JAX reference (un-folded path, for correctness) ---------
def im2col_3x3(x_nhwc):
    B, Hh, Ww, C = x_nhwc.shape
    xp = jnp.pad(x_nhwc, ((0, 0), (1, 1), (1, 1), (0, 0)))
    cols = []
    for dh in range(KH):
        for dw in range(KW):
            cols.append(xp[:, dh:dh + Hh, dw:dw + Ww, :])
    patches = jnp.stack(cols, axis=3)                 # (B, H, W, 9, C)
    return patches.reshape(B, Hh * Ww, KH * KW * C)


def reference_forward(x_nchw, p):
    x = jnp.transpose(x_nchw, (0, 2, 3, 1))
    patches = im2col_3x3(x)
    conv = jnp.maximum(patches @ p["wconv"] + p["bconv"], 0.0)
    h = jnp.mean(conv, axis=1)                        # GAP -> (B, 32)
    h1 = jnp.maximum(h @ p["w1"] + p["b1"], 0.0)
    h2 = h1 @ p["w2"] + p["b2"]
    return h2 @ p["wc"] + p["bc"]


if __name__ == "__main__":
    key = jax.random.PRNGKey(0)
    k_x, k_p = jax.random.split(key)
    x = jax.random.normal(k_x, (2, C_IN, H, W), jnp.float32)   # NCHW, like PyTorch
    params = init_params(k_p)
    derived = prepare_derived(params)

    out = moon_wrapper_forward(x, derived)
    out = jax.block_until_ready(out)

    ref = reference_forward(x, params)
    np.testing.assert_allclose(np.asarray(out), np.asarray(ref), rtol=1e-4, atol=1e-4)
    assert out.shape == (2, N_CLASS)
    print("KERNEL_OK")
</pallas_src>

<mosaic_0001>
module attributes {stable_mosaic.version = 11 : i64} {
  func.func @moon_kernel(%arg0: i32, %arg1: memref<8x18x72xf32, #tpu.memory_space<vmem>>, %arg2: memref<3x72x512xf32, #tpu.memory_space<vmem>>, %arg3: memref<1x512xf32, #tpu.memory_space<vmem>>, %arg4: memref<512x16xf32, #tpu.memory_space<vmem>>, %arg5: memref<1x16xf32, #tpu.memory_space<vmem>>, %arg6: memref<16x128xf32, #tpu.memory_space<vmem>>, %arg7: memref<1x128xf32, #tpu.memory_space<vmem>>, %arg8: memref<8x128xf32, #tpu.memory_space<vmem>>) attributes {dimension_semantics = [#tpu.dimension_semantics<parallel>], iteration_bounds = array<i64: 1>, scalar_prefetch = 0 : i64, scratch_operands = 0 : i64, tpu.core_type = #tpu.core_type<tc>, window_params = [{transform_indices = @transform_0, window_bounds = array<i64: 8, 18, 72>}, {pipeline_mode = #tpu.pipeline_mode<synchronous>, transform_indices = @transform_1, window_bounds = array<i64: 3, 72, 512>}, {pipeline_mode = #tpu.pipeline_mode<synchronous>, transform_indices = @transform_2, window_bounds = array<i64: 1, 512>}, {pipeline_mode = #tpu.pipeline_mode<synchronous>, transform_indices = @transform_3, window_bounds = array<i64: 512, 16>}, {pipeline_mode = #tpu.pipeline_mode<synchronous>, transform_indices = @transform_4, window_bounds = array<i64: 1, 16>}, {pipeline_mode = #tpu.pipeline_mode<synchronous>, transform_indices = @transform_5, window_bounds = array<i64: 16, 128>}, {pipeline_mode = #tpu.pipeline_mode<synchronous>, transform_indices = @transform_6, window_bounds = array<i64: 1, 128>}, {transform_indices = @transform_7, window_bounds = array<i64: 8, 128>}]} {
    %c0 = arith.constant 0 : index
    %c0_0 = arith.constant 0 : index
    %c0_1 = arith.constant 0 : index
    %0 = vector.load %arg1[%c0, %c0_0, %c0_1] : memref<8x18x72xf32, #tpu.memory_space<vmem>>, vector<8x16x72xf32>
    %1 = vector.shape_cast %0 : vector<8x16x72xf32> to vector<128x72xf32>
    %c0_2 = arith.constant 0 : index
    %c0_3 = arith.constant 0 : index
    %c0_4 = arith.constant 0 : index
    %2 = vector.load %arg2[%c0_2, %c0_3, %c0_4] : memref<3x72x512xf32, #tpu.memory_space<vmem>>, vector<1x72x512xf32>
    %3 = vector.shape_cast %2 : vector<1x72x512xf32> to vector<72x512xf32>
    %cst = arith.constant dense<0.000000e+00> : vector<128x512xf32>
    %4 = tpu.matmul %1, %3, %cst {dimension_numbers = #tpu.dot_dimension_numbers<[1], [0], [0], [1], [0, 0, 1, 1], [], []>} : vector<128x72xf32>, vector<72x512xf32>, vector<128x512xf32> -> vector<128x512xf32>
    %c0_5 = arith.constant 0 : index
    %c1 = arith.constant 1 : index
    %c0_6 = arith.constant 0 : index
    %5 = vector.load %arg1[%c0_5, %c1, %c0_6] : memref<8x18x72xf32, #tpu.memory_space<vmem>>, vector<8x16x72xf32>
    %6 = vector.shape_cast %5 : vector<8x16x72xf32> to vector<128x72xf32>
    %c1_7 = arith.constant 1 : index
    %c0_8 = arith.constant 0 : index
    %c0_9 = arith.constant 0 : index
    %7 = vector.load %arg2[%c1_7, %c0_8, %c0_9] : memref<3x72x512xf32, #tpu.memory_space<vmem>>, vector<1x72x512xf32>
    %8 = vector.shape_cast %7 : vector<1x72x512xf32> to vector<72x512xf32>
    %cst_10 = arith.constant dense<0.000000e+00> : vector<128x512xf32>
    %9 = tpu.matmul %6, %8, %cst_10 {dimension_numbers = #tpu.dot_dimension_numbers<[1], [0], [0], [1], [0, 0, 1, 1], [], []>} : vector<128x72xf32>, vector<72x512xf32>, vector<128x512xf32> -> vector<128x512xf32>
    %10 = arith.addf %4, %9 : vector<128x512xf32>
    %c0_11 = arith.constant 0 : index
    %c2 = arith.constant 2 : index
    %c0_12 = arith.constant 0 : index
    %11 = vector.load %arg1[%c0_11, %c2, %c0_12] : memref<8x18x72xf32, #tpu.memory_space<vmem>>, vector<8x16x72xf32>
    %12 = vector.shape_cast %11 : vector<8x16x72xf32> to vector<128x72xf32>
    %c2_13 = arith.constant 2 : index
    %c0_14 = arith.constant 0 : index
    %c0_15 = arith.constant 0 : index
    %13 = vector.load %arg2[%c2_13, %c0_14, %c0_15] : memref<3x72x512xf32, #tpu.memory_space<vmem>>, vector<1x72x512xf32>
    %14 = vector.shape_cast %13 : vector<1x72x512xf32> to vector<72x512xf32>
    %cst_16 = arith.constant dense<0.000000e+00> : vector<128x512xf32>
    %15 = tpu.matmul %12, %14, %cst_16 {dimension_numbers = #tpu.dot_dimension_numbers<[1], [0], [0], [1], [0, 0, 1, 1], [], []>} : vector<128x72xf32>, vector<72x512xf32>, vector<128x512xf32> -> vector<128x512xf32>
    %16 = arith.addf %10, %15 : vector<128x512xf32>
    %c0_17 = arith.constant 0 : index
    %c0_18 = arith.constant 0 : index
    %17 = vector.load %arg3[%c0_17, %c0_18] : memref<1x512xf32, #tpu.memory_space<vmem>>, vector<1x512xf32>
    %18 = vector.broadcast %17 : vector<1x512xf32> to vector<128x512xf32>
    %19 = arith.addf %16, %18 : vector<128x512xf32>
    %cst_19 = arith.constant 0.000000e+00 : f32
    %20 = vector.broadcast %cst_19 : f32 to vector<128x512xf32>
    %21 = arith.maximumf %19, %20 : vector<128x512xf32>
    %c0_20 = arith.constant 0 : index
    %c0_21 = arith.constant 0 : index
    %22 = vector.load %arg4[%c0_20, %c0_21] : memref<512x16xf32, #tpu.memory_space<vmem>>, vector<512x16xf32>
    %cst_22 = arith.constant dense<0.000000e+00> : vector<128x16xf32>
    %23 = tpu.matmul %21, %22, %cst_22 {dimension_numbers = #tpu.dot_dimension_numbers<[1], [0], [0], [1], [0, 0, 1, 1], [], []>} : vector<128x512xf32>, vector<512x16xf32>, vector<128x16xf32> -> vector<128x16xf32>
    %24 = vector.shape_cast %23 : vector<128x16xf32> to vector<8x16x16xf32>
    %cst_23 = arith.constant dense<0.000000e+00> : vector<8x16xf32>
    %25 = vector.multi_reduction <add>, %24, %cst_23 [1] : vector<8x16x16xf32> to vector<8x16xf32>
    %c0_24 = arith.constant 0 : index
    %c0_25 = arith.constant 0 : index
    %26 = vector.load %arg5[%c0_24, %c0_25] : memref<1x16xf32, #tpu.memory_space<vmem>>, vector<1x16xf32>
    %27 = vector.broadcast %26 : vector<1x16xf32> to vector<8x16xf32>
    %28 = arith.addf %25, %27 : vector<8x16xf32>
    %cst_26 = arith.constant 0.000000e+00 : f32
    %29 = vector.broadcast %cst_26 : f32 to vector<8x16xf32>
    %30 = arith.maximumf %28, %29 : vector<8x16xf32>
    %c0_27 = arith.constant 0 : index
    %c0_28 = arith.constant 0 : index
    %31 = vector.load %arg6[%c0_27, %c0_28] : memref<16x128xf32, #tpu.memory_space<vmem>>, vector<16x128xf32>
    %cst_29 = arith.constant dense<0.000000e+00> : vector<8x128xf32>
    %32 = tpu.matmul %30, %31, %cst_29 {dimension_numbers = #tpu.dot_dimension_numbers<[1], [0], [0], [1], [0, 0, 1, 1], [], []>} : vector<8x16xf32>, vector<16x128xf32>, vector<8x128xf32> -> vector<8x128xf32>
    %c0_30 = arith.constant 0 : index
    %c0_31 = arith.constant 0 : index
    %33 = vector.load %arg7[%c0_30, %c0_31] : memref<1x128xf32, #tpu.memory_space<vmem>>, vector<1x128xf32>
    %34 = vector.broadcast %33 : vector<1x128xf32> to vector<8x128xf32>
    %35 = arith.addf %32, %34 : vector<8x128xf32>
    %c0_32 = arith.constant 0 : index
    %c0_33 = arith.constant 0 : index
    %36 = vector.load %arg8[%c0_32, %c0_33] : memref<8x128xf32, #tpu.memory_space<vmem>>, vector<8x128xf32>
    tpu.vector_store %arg8[%c0_32, %c0_33], %35 {strides = array<i32>} : memref<8x128xf32, #tpu.memory_space<vmem>>, vector<8x128xf32>,
    return
  }
  func.func @transform_0(%arg0: i32) -> (i32, i32, i32) {
    %c0_i32 = arith.constant 0 : i32
    %c0_i32_0 = arith.constant 0 : i32
    %c0_i32_1 = arith.constant 0 : i32
    return %arg0, %c0_i32, %c0_i32_0 : i32, i32, i32
  }
  func.func @transform_1(%arg0: i32) -> (i32, i32, i32) {
    %c0_i32 = arith.constant 0 : i32
    %c0_i32_0 = arith.constant 0 : i32
    %c0_i32_1 = arith.constant 0 : i32
    %c0_i32_2 = arith.constant 0 : i32
    return %c0_i32, %c0_i32_0, %c0_i32_1 : i32, i32, i32
  }
  func.func @transform_2(%arg0: i32) -> (i32, i32) {
    %c0_i32 = arith.constant 0 : i32
    %c0_i32_0 = arith.constant 0 : i32
    %c0_i32_1 = arith.constant 0 : i32
    return %c0_i32, %c0_i32_0 : i32, i32
  }
  func.func @transform_3(%arg0: i32) -> (i32, i32) {
    %c0_i32 = arith.constant 0 : i32
    %c0_i32_0 = arith.constant 0 : i32
    %c0_i32_1 = arith.constant 0 : i32
    return %c0_i32, %c0_i32_0 : i32, i32
  }
  func.func @transform_4(%arg0: i32) -> (i32, i32) {
    %c0_i32 = arith.constant 0 : i32
    %c0_i32_0 = arith.constant 0 : i32
    %c0_i32_1 = arith.constant 0 : i32
    return %c0_i32, %c0_i32_0 : i32, i32
  }
  func.func @transform_5(%arg0: i32) -> (i32, i32) {
    %c0_i32 = arith.constant 0 : i32
    %c0_i32_0 = arith.constant 0 : i32
    %c0_i32_1 = arith.constant 0 : i32
    return %c0_i32, %c0_i32_0 : i32, i32
  }
  func.func @transform_6(%arg0: i32) -> (i32, i32) {
    %c0_i32 = arith.constant 0 : i32
    %c0_i32_0 = arith.constant 0 : i32
    %c0_i32_1 = arith.constant 0 : i32
    return %c0_i32, %c0_i32_0 : i32, i32
  }
  func.func @transform_7(%arg0: i32) -> (i32, i32) {
    %c0_i32 = arith.constant 0 : i32
    %c0_i32_0 = arith.constant 0 : i32
    return %arg0, %c0_i32 : i32, i32
  }
}

</mosaic_0001>

<bundles_post_ra>
// kernel: tpu_custom_call.1
= control target key start
LH: loop header
LB: loop body
LE: loop exit
PB: predicated region body
PF: predicated region fallthrough
CT: control target
= control target key end

     0   :  { %v2745_v7 = vmov 0.0   ;;  %vm132_vm0 = vcmask 588800   ;;  %s3768_s0 = inlined_call_operand.vmem [shape: f32[8,18,72], index: 0, kind: input, shape index: {}]   ;;  %s3769_s1 = inlined_call_operand.vmem [shape: f32[3,72,512], index: 1, kind: input, shape index: {}]   ;;  %s3770_s2 = inlined_call_operand.vmem [shape: f32[1,512], index: 2, kind: input, shape index: {}]   ;;  %s3771_s3 = inlined_call_operand.vmem [shape: f32[512,16], index: 3, kind: input, shape index: {}]   ;;  %s3772_s4 = inlined_call_operand.vmem [shape: f32[1,16], index: 4, kind: input, shape index: {}]   ;;  %s3773_s5 = inlined_call_operand.vmem [shape: f32[16,128], index: 5, kind: input, shape index: {}]   ;;  %s3774_s6 = inlined_call_operand.vmem [shape: f32[1,128], index: 6, kind: input, shape index: {}]   ;;  %s3775_s7 = inlined_call_operand.hbm [shape: f32[8,128], index: 7, kind: output, shape index: {}]  }
   0x1   :  { %v2086_v0 = vld [vmem:[%s3769_s1 + $0x128] sm:$0xff]  ;;  %v2088_v2 = vld [vmem:[%s3769_s1 + $0x138] sm:$0xff]  ;;  %v2085_v5 = vld [vmem:[%s3769_s1 + $0x120] sm:$0xff]  ;;  %245 = vmatprep.mubr.f32.mxu0 %v2745_v7  ;;  %406 = vmatprep.mubr.f32.mxu1 %v2745_v7 }
   0x2   :  { %v2090_v1 = vld [vmem:[%s3769_s1 + $0x148] sm:$0xff]  ;;  %v2092_v4 = vld [vmem:[%s3769_s1 + $0x158] sm:$0xff]  ;;  %v2089_v6 = vld [vmem:[%s3769_s1 + $0x140] sm:$0xff] }
   0x3   :  { %v2426_v3 = vpack.c.bf16 %v2090_v1, %v2086_v0  ;;  %v2442_v8 = vpack.c.bf16 %v2092_v4, %v2088_v2  ;;  %v2428_v9 = vpack.c.bf16 %v2089_v6, %v2085_v5  ;;  %v2087_v10 = vld [vmem:[%s3769_s1 + $0x130] sm:$0xff]  ;;  %v2094_v12 = vld [vmem:[%s3769_s1 + $0x168] sm:$0xff]  ;;  %v2096_v15 = vld [vmem:[%s3769_s1 + $0x178] sm:$0xff] }
   0x4   :  { %v2091_v11 = vld [vmem:[%s3769_s1 + $0x150] sm:$0xff]  ;;  %v2098_v14 = vld [vmem:[%s3769_s1 + $0x188] sm:$0xff]  ;;  %v2100_v16 = vld [vmem:[%s3769_s1 + $0x198] sm:$0xff] }
   0x5   :  { %2427 = vmatprep.subr.bf16.mxu0 %v2426_v3  ;;  %v2444_v13 = vpack.c.bf16 %v2091_v11, %v2087_v10  ;;  %2443 = vmatprep.subr.bf16.mxu1 %v2442_v8  ;;  %v2430_v17 = vpack.c.bf16 %v2098_v14, %v2094_v12  ;;  %v2446_v18 = vpack.c.bf16 %v2100_v16, %v2096_v15  ;;  %v2093_v19 = vld [vmem:[%s3769_s1 + $0x160] sm:$0xff]  ;;  %v2095_v21 = vld [vmem:[%s3769_s1 + $0x170] sm:$0xff]  ;;  %v2102_v24 = vld [vmem:[%s3769_s1 + $0x1a8] sm:$0xff] }
   0x6   :  { %2429 = vmatpush1.bf16.msra.mxu0 %v2428_v9  ;;  %v2097_v20 = vld [vmem:[%s3769_s1 + $0x180] sm:$0xff]  ;;  %v2099_v23 = vld [vmem:[%s3769_s1 + $0x190] sm:$0xff]  ;;  %v2106_v25 = vld [vmem:[%s3769_s1 + $0x1c8] sm:$0xff] }
   0x7   :  { %2445 = vmatpush1.bf16.msra.mxu1 %v2444_v13  ;;  %v2432_v22 = vpack.c.bf16 %v2097_v20, %v2093_v19  ;;  %2431 = vmatprep.subr.bf16.mxu0 %v2430_v17  ;;  %v2448_v26 = vpack.c.bf16 %v2099_v23, %v2095_v21  ;;  %v2434_v27 = vpack.c.bf16 %v2106_v25, %v2102_v24  ;;  %v2104_v28 = vld [vmem:[%s3769_s1 + $0x1b8] sm:$0xff]  ;;  %v2101_v30 = vld [vmem:[%s3769_s1 + $0x1a0] sm:$0xff]  ;;  %v2103_v33 = vld [vmem:[%s3769_s1 + $0x1b0] sm:$0xff] }
   0x8   :  { %2447 = vmatprep.subr.bf16.mxu1 %v2446_v18  ;;  %v2108_v29 = vld [vmem:[%s3769_s1 + $0x1d8] sm:$0xff]  ;;  %v2105_v32 = vld [vmem:[%s3769_s1 + $0x1c0] sm:$0xff]  ;;  %v2107_v34 = vld [vmem:[%s3769_s1 + $0x1d0] sm:$0xff] }
   0x9   :  { %v2450_v31 = vpack.c.bf16 %v2108_v29, %v2104_v28  ;;  %v2436_v35 = vpack.c.bf16 %v2105_v32, %v2101_v30  ;;  %v2110_v36 = vld [vmem:[%s3769_s1 + $0x1e8] sm:$0xff]  ;;  %v2112_v38 = vld [vmem:[%s3769_s1 + $0x1f8] sm:$0xff]  ;;  %v2452_v39 = vpack.c.bf16 %v2107_v34, %v2103_v33  ;;  %v2109_v42 = vld [vmem:[%s3769_s1 + $0x1e0] sm:$0xff] }
   0xa   :  { %2433 = vmatpush1.bf16.msra.mxu0 %v2432_v22  ;;  %v2114_v37 = vld [vmem:[%s3769_s1 + $0x208] sm:$0xff]  ;;  %v2116_v41 = vld [vmem:[%s3769_s1 + $0x218] sm:$0xff]  ;;  %v2113_v43 = vld [vmem:[%s3769_s1 + $0x200] sm:$0xff] }
   0xb   :  { %2449 = vmatpush1.bf16.msra.mxu1 %v2448_v26  ;;  %2435 = vmatprep.subr.bf16.mxu0 %v2434_v27  ;;  %v2438_v40 = vpack.c.bf16 %v2114_v37, %v2110_v36  ;;  %v2454_v44 = vpack.c.bf16 %v2116_v41, %v2112_v38  ;;  %v2111_v45 = vld [vmem:[%s3769_s1 + $0x1f0] sm:$0xff]  ;;  %v2440_v47 = vpack.c.bf16 %v2113_v43, %v2109_v42  ;;  %v2118_v49 = vld [vmem:[%s3769_s1 + $0x228] sm:$0xff]  ;;  %v2120_v50 = vld [vmem:[%s3769_s1 + $0x238] sm:$0xff] }
   0xc   :  { %2451 = vmatprep.subr.bf16.mxu1 %v2450_v31  ;;  %v2115_v46 = vld [vmem:[%s3769_s1 + $0x210] sm:$0xff]  ;;  %v44_v51 = vld [vmem:[%s3769_s1 + $0x8] sm:$0xff]  ;;  %v46_v53 = vld [vmem:[%s3769_s1 + $0x18] sm:$0xff] }
   0xd   :  { %v2456_v48 = vpack.c.bf16 %v2115_v46, %v2111_v45  ;;  %v48_v52 = vld [vmem:[%s3769_s1 + $0x28] sm:$0xff]  ;;  %v50_v54 = vld [vmem:[%s3769_s1 + $0x38] sm:$0xff]  ;;  %v43_v55 = vld [vmem:[%s3769_s1] sm:$0xff] }
   0xe   :  { %2437 = vmatpush1.bf16.msra.mxu0 %v2436_v35  ;;  %v47_v56 = vld [vmem:[%s3769_s1 + $0x20] sm:$0xff]  ;;  %v45_v58 = vld [vmem:[%s3769_s1 + $0x10] sm:$0xff]  ;;  %v2458_v62 = vpack.c.bf16 %v48_v52, %v44_v51  ;;  %v2474_v63 = vpack.c.bf16 %v50_v54, %v46_v53  ;;  %v52_v2 = vld [vmem:[%s3769_s1 + $0x48] sm:$0xff] }
   0xf   :  { %2453 = vmatpush1.bf16.msra.mxu1 %v2452_v39  ;;  %2439 = vmatprep.subr.bf16.mxu0 %v2438_v40  ;;  %v2117_v57 = vld [vmem:[%s3769_s1 + $0x220] sm:$0xff]  ;;  %v49_v59 = vld [vmem:[%s3769_s1 + $0x30] sm:$0xff]  ;;  %v2460_v0 = vpack.c.bf16 %v47_v56, %v43_v55  ;;  %v56_v3 = vld [vmem:[%s3769_s1 + $0x68] sm:$0xff] }
  0x10   :  { %2455 = vmatprep.subr.bf16.mxu1 %v2454_v44  ;;  %v2119_v60 = vld [vmem:[%s3769_s1 + $0x230] sm:$0xff]  ;;  %v79_v61 = vld [vmem:[%s3768_s0 + $0x1] sm:$0xff]  ;;  %v2476_v1 = vpack.c.bf16 %v49_v59, %v45_v58  ;;  %v54_v4 = vld [vmem:[%s3769_s1 + $0x58] sm:$0xff]  ;;  %v2462_v12 = vpack.c.bf16 %v56_v3, %v52_v2 }
  0x11   :  { %v58_v5 = vld [vmem:[%s3769_s1 + $0x78] sm:$0xff]  ;;  %v51_v6 = vld [vmem:[%s3769_s1 + $0x40] sm:$0xff]  ;;  %v80_v9 = vld [vmem:[%s3768_s0 + $0x9] sm:$0xff] }
  0x12   :  { %2441 = vmatpush1.bf16.msra.mxu0 %v2440_v47  ;;  %v55_v8 = vld [vmem:[%s3769_s1 + $0x60] sm:$0xff]  ;;  %v53_v10 = vld [vmem:[%s3769_s1 + $0x50] sm:$0xff]  ;;  %v2478_v13 = vpack.c.bf16 %v58_v5, %v54_v4  ;;  %v60_v15 = vld [vmem:[%s3769_s1 + $0x88] sm:$0xff] }
  0x13   :  { %2457 = vmatpush1.bf16.msra.mxu1 %v2456_v48  ;;  %197 = vmatprep.subr.mxu0 %v2118_v49  ;;  %v57_v11 = vld [vmem:[%s3769_s1 + $0x70] sm:$0xff]  ;;  %v2464_v14 = vpack.c.bf16 %v55_v8, %v51_v6  ;;  %v64_v16 = vld [vmem:[%s3769_s1 + $0xa8] sm:$0xff]  ;;  %v62_v17 = vld [vmem:[%s3769_s1 + $0x98] sm:$0xff] }
  0x14   :  { %358 = vmatprep.subr.mxu1 %v2120_v50  ;;  %v2480_v18 = vpack.c.bf16 %v57_v11, %v53_v10  ;;  %v66_v19 = vld [vmem:[%s3769_s1 + $0xb8] sm:$0xff]  ;;  %v59_v20 = vld [vmem:[%s3769_s1 + $0x80] sm:$0xff]  ;;  %v61_v23 = vld [vmem:[%s3769_s1 + $0x90] sm:$0xff]  ;;  %v2466_v25 = vpack.c.bf16 %v64_v16, %v60_v15 }
  0x15   :  { %v63_v21 = vld [vmem:[%s3769_s1 + $0xa0] sm:$0xff]  ;;  %v65_v24 = vld [vmem:[%s3769_s1 + $0xb0] sm:$0xff]  ;;  %v2482_v26 = vpack.c.bf16 %v66_v19, %v62_v17  ;;  %v68_v28 = vld [vmem:[%s3769_s1 + $0xc8] sm:$0xff] }
  0x16   :  { %198 = vmatpush1.msra.mxu0 %v2117_v57  ;;  %v81_v22 = vld [vmem:[%s3768_s0 + $0x19] sm:$0xff]  ;;  %v2468_v27 = vpack.c.bf16 %v63_v21, %v59_v20  ;;  %v72_v29 = vld [vmem:[%s3769_s1 + $0xe8] sm:$0xff]  ;;  %v2484_v31 = vpack.c.bf16 %v65_v24, %v61_v23  ;;  %v69_v36 = vld [vmem:[%s3769_s1 + $0xd0] sm:$0xff] }
  0x17   :  { %359 = vmatpush1.msra.mxu1 %v2119_v60  ;;  %2121 = vmatmul.mubr.msk.f32.vlgmr.msra.gmra.mrb[0].mxu0 %vm132_vm0, %v79_v61  ;;  %v70_v30 = vld [vmem:[%s3769_s1 + $0xd8] sm:$0xff]  ;;  %v67_v33 = vld [vmem:[%s3769_s1 + $0xc0] sm:$0xff]  ;;  %v73_v37 = vld [vmem:[%s3769_s1 + $0xf0] sm:$0xff]  ;;  %v2470_v38 = vpack.c.bf16 %v72_v29, %v68_v28 }
  0x18   :  { %2137 = vmatmul.mubr.msk.f32.vlgmr.msra.gmra.mrb[0].mxu1 %vm132_vm0, %v79_v61  ;;  %2459 = vmatprep.subr.bf16.mxu0 %v2458_v62  ;;  %v74_v32 = vld [vmem:[%s3769_s1 + $0xf8] sm:$0xff]  ;;  %v71_v34 = vld [vmem:[%s3769_s1 + $0xe0] sm:$0xff]  ;;  %v2488_v41 = vpack.c.bf16 %v73_v37, %v69_v36  ;;  %v76_v43 = vld [vmem:[%s3769_s1 + $0x108] sm:$0xff] }
  0x19   :  { %2475 = vmatprep.subr.bf16.mxu1 %v2474_v63  ;;  %2461 = vmatpush1.bf16.msra.mxu0 %v2460_v0  ;;  %v82_v35 = vld [vmem:[%s3768_s0 + $0x21] sm:$0xff]  ;;  %v2486_v39 = vpack.c.bf16 %v74_v32, %v70_v30  ;;  %v2472_v40 = vpack.c.bf16 %v71_v34, %v67_v33  ;;  %v83_v42 = vld [vmem:[%s3768_s0 + $0x31] sm:$0xff]  ;;  %v84_v50 = vld [vmem:[%s3768_s0 + $0x39] sm:$0xff] }
  0x1a   :  { %2477 = vmatpush1.bf16.msra.mxu1 %v2476_v1  ;;  %251 = vmatprep.mubr.f32.mxu0 %v2745_v7  ;;  %v78_v44 = vld [vmem:[%s3769_s1 + $0x118] sm:$0xff]  ;;  %v2186_v45 = vld [vmem:[%s3769_s1 + $0x248] sm:$0xff]  ;;  %v75_v47 = vld [vmem:[%s3769_s1 + $0x100] sm:$0xff] }
  0x1b   :  { %412 = vmatprep.mubr.f32.mxu1 %v2745_v7  ;;  %2122 = vmatmul.mubr.msk.f32.gmra.mrb[2].mxu0 %vm132_vm0, %v80_v9  ;;  %v2190_v46 = vld [vmem:[%s3769_s1 + $0x268] sm:$0xff]  ;;  %v2188_v48 = vld [vmem:[%s3769_s1 + $0x258] sm:$0xff]  ;;  %v77_v51 = vld [vmem:[%s3769_s1 + $0x110] sm:$0xff] }
  0x1c   :  { %2138 = vmatmul.mubr.msk.f32.gmra.mrb[2].mxu1 %vm132_vm0, %v80_v9  ;;  %257 = vmatprep.mubr.f32.mxu0 %v2745_v7  ;;  %v2192_v49 = vld [vmem:[%s3769_s1 + $0x278] sm:$0xff]  ;;  %v2490_v52 = vpack.c.bf16 %v2190_v46, %v2186_v45  ;;  %v85_v54 = vld [vmem:[%s3768_s0 + $0x49] sm:$0xff] }
  0x1d   :  { %418 = vmatprep.mubr.f32.mxu1 %v2745_v7  ;;  %2463 = vmatprep.subr.bf16.mxu0 %v2462_v12  ;;  %v2506_v53 = vpack.c.bf16 %v2192_v49, %v2188_v48  ;;  %v86_v55 = vld [vmem:[%s3768_s0 + $0x51] sm:$0xff] }
  0x1e   :  { %2479 = vmatprep.subr.bf16.mxu1 %v2478_v13  ;;  %2465 = vmatpush1.bf16.msra.mxu0 %v2464_v14 }
  0x1f   :  { %2123 = vmatmul.mubr.msk.f32.gmra.mrb[4].mxu0 %vm132_vm0, %v81_v22  ;;  %2481 = vmatpush1.bf16.msra.mxu1 %v2480_v18 }
  0x20   :  { %2139 = vmatmul.mubr.msk.f32.gmra.mrb[4].mxu1 %vm132_vm0, %v81_v22  ;;  %263 = vmatprep.mubr.f32.mxu0 %v2745_v7 }
  0x21   :  { %424 = vmatprep.mubr.f32.mxu1 %v2745_v7  ;;  %2467 = vmatprep.subr.bf16.mxu0 %v2466_v25 }
  0x22   :  { %2483 = vmatprep.subr.bf16.mxu1 %v2482_v26  ;;  %2469 = vmatpush1.bf16.msra.mxu0 %v2468_v27 }
  0x23   :  { %2124 = vmatmul.mubr.msk.f32.gmra.mrb[6].mxu0 %vm132_vm0, %v82_v35  ;;  %2485 = vmatpush1.bf16.msra.mxu1 %v2484_v31 }
  0x24   :  { %2140 = vmatmul.mubr.msk.f32.gmra.mrb[6].mxu1 %vm132_vm0, %v82_v35  ;;  %269 = vmatprep.mubr.f32.mxu0 %v2745_v7 }
  0x25   :  { %430 = vmatprep.mubr.f32.mxu1 %v2745_v7  ;;  %2471 = vmatprep.subr.bf16.mxu0 %v2470_v38 }
  0x26   :  { %2487 = vmatprep.subr.bf16.mxu1 %v2486_v39  ;;  %2473 = vmatpush1.bf16.msra.mxu0 %v2472_v40 }
  0x27   :  { %2125 = vmatmul.mubr.msk.f32.gmra.mrb[8].mxu0 %vm132_vm0, %v83_v42  ;;  %2489 = vmatpush1.bf16.msra.mxu1 %v2488_v41 }
  0x28   :  { %2141 = vmatmul.mubr.msk.f32.gmra.mrb[8].mxu1 %vm132_vm0, %v83_v42  ;;  %275 = vmatprep.mubr.f32.mxu0 %v2745_v7 }
  0x29   :  { %436 = vmatprep.mubr.f32.mxu1 %v2745_v7  ;;  %567 = vmatprep.subr.mxu0 %v76_v43 }
  0x2a   :  { %728 = vmatprep.subr.mxu1 %v78_v44  ;;  %568 = vmatpush1.msra.mxu0 %v75_v47 }
  0x2b   :  { %2126 = vmatmul.mubr.msk.f32.gmra.mrb[10].mxu0 %vm132_vm0, %v84_v50  ;;  %729 = vmatpush1.msra.mxu1 %v77_v51 }
  0x2c   :  { %2142 = vmatmul.mubr.msk.f32.gmra.mrb[10].mxu1 %vm132_vm0, %v84_v50  ;;  %281 = vmatprep.mubr.f32.mxu0 %v2745_v7 }
  0x2d   :  { %442 = vmatprep.mubr.f32.mxu1 %v2745_v7  ;;  %2491 = vmatprep.subr.bf16.mxu0 %v2490_v52 }
  0x2e   :  { %2507 = vmatprep.subr.bf16.mxu1 %v2506_v53 }
  0x2f   :  { %2127 = vmatmul.mubr.msk.f32.gmra.mrb[12].mxu0 %vm132_vm0, %v85_v54 }
  0x30   :  { %2143 = vmatmul.mubr.msk.f32.gmra.mrb[12].mxu1 %vm132_vm0, %v85_v54  ;;  %287 = vmatprep.mubr.f32.mxu0 %v2745_v7 }
  0x31   :  { %448 = vmatprep.mubr.f32.mxu1 %v2745_v7 }
  0x33   :  { %2128 = vmatmul.mubr.msk.f32.gmra.mrb[14].mxu0 %vm132_vm0, %v86_v55 }
  0x34   :  { %12 = vsyncpa [#allocation3], 0  ;;  %2144 = vmatmul.mubr.msk.f32.gmra.mrb[14].mxu1 %vm132_vm0, %v86_v55  ;;  %293 = vmatprep.mubr.f32.mxu0 %v2745_v7  ;;  %v87_v56 = vld [vmem:[%s3768_s0 + $0x61] sm:$0xff]  ;;  %v88_v57 = vld [vmem:[%s3768_s0 + $0x69] sm:$0xff]  ;;  %vm2747_vm1 = vmmov 0   ;;  %vm1864_vm2 = vcmask 130048  }
  0x35   :  { %454 = vmatprep.mubr.f32.mxu1 %v2745_v7  ;;  %v89_v58 = vld [vmem:[%s3768_s0 + $0x79] sm:$0xff]  ;;  %v90_v59 = vld [vmem:[%s3768_s0 + $0x81] sm:$0xff]  ;;  %v91_v60 = vld [vmem:[%s3768_s0 + $0x91] sm:$0xff]  ;;  %vm1978_vm3 = vcmask 1041409   ;;  %vm1981_vm4 = vcmask 1042434   ;;  %vm1984_vm5 = vcmask 1043459  }
  0x36   :  { %v92_v61 = vld [vmem:[%s3768_s0 + $0x99] sm:$0xff]  ;;  %v93_v62 = vld [vmem:[%s3768_s0 + $0xa9] sm:$0xff]  ;;  %v94_v63 = vld [vmem:[%s3768_s0 + $0xb1] sm:$0xff]  ;;  %vm1987_vm6 = vcmask 1044484   ;;  %vm1990_vm7 = vcmask 1045509   ;;  %vm1993_vm8 = vcmask 1046534  }
  0x37   :  { %2129 = vmatmul.mubr.msk.f32.gmra.mrb[16].mxu0 %vm132_vm0, %v87_v56  ;;  %v2185_v0 = vld [vmem:[%s3769_s1 + $0x240] sm:$0xff]  ;;  %v2187_v2 = vld [vmem:[%s3769_s1 + $0x250] sm:$0xff]  ;;  %v2194_v4 = vld [vmem:[%s3769_s1 + $0x288] sm:$0xff]  ;;  %vm1996_vm9 = vcmask 1047559   ;;  %s2748_s24 = smov [#allocation2]  }
  0x38   :  { %2145 = vmatmul.mubr.msk.f32.gmra.mrb[16].mxu1 %vm132_vm0, %v87_v56  ;;  %299 = vmatprep.mubr.f32.mxu0 %v2745_v7  ;;  %v2189_v1 = vld [vmem:[%s3769_s1 + $0x260] sm:$0xff]  ;;  %v2191_v3 = vld [vmem:[%s3769_s1 + $0x270] sm:$0xff]  ;;  %v2198_v5 = vld [vmem:[%s3769_s1 + $0x2a8] sm:$0xff]  ;;  %s2077_s25 = sshll.u32 %s2748_s24, 4  ;;  %s2078_s25 = int_to_ptr.vmem [resolvable:$true] %s2077_s25 }
  0x39   :  { %460 = vmatprep.mubr.f32.mxu1 %v2745_v7  ;;  %v27_v6 = vld [vmem:[%s3768_s0] sm:$0xff]  ;;  %v2492_v8 = vpack.c.bf16 %v2189_v1, %v2185_v0  ;;  %v2196_v9 = vld [vmem:[%s3769_s1 + $0x298] sm:$0xff]  ;;  %v2508_v11 = vpack.c.bf16 %v2191_v3, %v2187_v2  ;;  %v2494_v12 = vpack.c.bf16 %v2198_v5, %v2194_v4  ;;  %v2195_v15 = vld [vmem:[%s3769_s1 + $0x290] sm:$0xff]  ;;  %s2721_s26 = scalar_lea.vmem %s2078_s25, 128  ;;  %p2726_p1 = scmp.lt.s32.totalorder %s2078_s25, %s2078_s25 }
  0x3a   :  { %v2200_v10 = vld [vmem:[%s3769_s1 + $0x2b8] sm:$0xff]  ;;  %v2193_v13 = vld [vmem:[%s3769_s1 + $0x280] sm:$0xff]  ;;  %v2199_v17 = vld [vmem:[%s3769_s1 + $0x2b0] sm:$0xff]  ;;  %p2722_p0 = scmp.ne.s32.totalorder %s2078_s25, %s2721_s26  ;;  %p2727_p2 = scmp.lt.s32.totalorder %s2721_s26, %s2721_s26 }
  0x3b   :  { %2130 = vmatmul.mubr.msk.f32.gmra.mrb[18].mxu0 %vm132_vm0, %v88_v57  ;;  %v2197_v14 = vld [vmem:[%s3769_s1 + $0x2a0] sm:$0xff]  ;;  %v2510_v16 = vpack.c.bf16 %v2200_v10, %v2196_v9  ;;  %v2202_v18 = vld [vmem:[%s3769_s1 + $0x2c8] sm:$0xff]  ;;  %v2204_v21 = vld [vmem:[%s3769_s1 + $0x2d8] sm:$0xff]  ;;  %v2512_v24 = vpack.c.bf16 %v2199_v17, %v2195_v15 }
  0x3c   :  { %2146 = vmatmul.mubr.msk.f32.gmra.mrb[18].mxu1 %vm132_vm0, %v88_v57  ;;  %305 = vmatprep.mubr.f32.mxu0 %v2745_v7  ;;  %v2206_v19 = vld [vmem:[%s3769_s1 + $0x2e8] sm:$0xff]  ;;  %v2208_v22 = vld [vmem:[%s3769_s1 + $0x2f8] sm:$0xff]  ;;  %v2496_v23 = vpack.c.bf16 %v2197_v14, %v2193_v13  ;;  %v2201_v26 = vld [vmem:[%s3769_s1 + $0x2c0] sm:$0xff]  ;;  %p2728_p3 = por %p2727_p2, %p2726_p1 }
  0x3d   :  { %466 = vmatprep.mubr.f32.mxu1 %v2745_v7  ;;  %v28_v20 = vld [vmem:[%s3768_s0 + $0x8] sm:$0xff]  ;;  %v2498_v25 = vpack.c.bf16 %v2206_v19, %v2202_v18  ;;  %v2205_v27 = vld [vmem:[%s3769_s1 + $0x2e0] sm:$0xff]  ;;  %v2203_v28 = vld [vmem:[%s3769_s1 + $0x2d0] sm:$0xff]  ;;  %v2514_v29 = vpack.c.bf16 %v2208_v22, %v2204_v21 }
  0x3e   :  { %v2207_v30 = vld [vmem:[%s3769_s1 + $0x2f0] sm:$0xff]  ;;  %v2210_v31 = vld [vmem:[%s3769_s1 + $0x308] sm:$0xff]  ;;  %v29_v33 = vld [vmem:[%s3768_s0 + $0x18] sm:$0xff]  ;;  %v2500_v36 = vpack.c.bf16 %v2205_v27, %v2201_v26  ;;  %p2729_p4 = pnand %p2728_p3, %p2722_p0 }
  0x3f   :  { %2131 = vmatmul.mubr.msk.f32.gmra.mrb[20].mxu0 %vm132_vm0, %v89_v58  ;;  %v2214_v32 = vld [vmem:[%s3769_s1 + $0x328] sm:$0xff]  ;;  %v2212_v34 = vld [vmem:[%s3769_s1 + $0x318] sm:$0xff]  ;;  %v2516_v37 = vpack.c.bf16 %v2207_v30, %v2203_v28  ;;  %v2209_v39 = vld [vmem:[%s3769_s1 + $0x300] sm:$0xff] }
  0x40   :  { %2147 = vmatmul.mubr.msk.f32.gmra.mrb[20].mxu1 %vm132_vm0, %v89_v58  ;;  %311 = vmatprep.mubr.f32.mxu0 %v2745_v7  ;;  %v2216_v35 = vld [vmem:[%s3769_s1 + $0x338] sm:$0xff]  ;;  %v2502_v38 = vpack.c.bf16 %v2214_v32, %v2210_v31  ;;  %v2213_v40 = vld [vmem:[%s3769_s1 + $0x320] sm:$0xff]  ;;  %v2211_v42 = vld [vmem:[%s3769_s1 + $0x310] sm:$0xff] }
  0x41   :  { %472 = vmatprep.mubr.f32.mxu1 %v2745_v7  ;;  %v2518_v41 = vpack.c.bf16 %v2216_v35, %v2212_v34  ;;  %v2215_v43 = vld [vmem:[%s3769_s1 + $0x330] sm:$0xff]  ;;  %v30_v44 = vld [vmem:[%s3768_s0 + $0x20] sm:$0xff]  ;;  %v2504_v45 = vpack.c.bf16 %v2213_v40, %v2209_v39  ;;  %v2218_v48 = vld [vmem:[%s3769_s1 + $0x348] sm:$0xff] }
  0x42   :  { %v31_v46 = vld [vmem:[%s3768_s0 + $0x30] sm:$0xff]  ;;  %v2520_v47 = vpack.c.bf16 %v2215_v43, %v2211_v42  ;;  %v1526_v49 = vld [vmem:[%s3771_s3 + $0x80] sm:$0xff]  ;;  %v1527_v50 = vld [vmem:[%s3771_s3 + $0x88] sm:$0xff] }
  0x43   :  { %2132 = vmatmul.mubr.msk.f32.gmra.mrb[22].mxu0 %vm132_vm0, %v90_v59  ;;  %v2220_v51 = vld [vmem:[%s3769_s1 + $0x358] sm:$0xff]  ;;  %v1558_v52 = vld [vmem:[%s3771_s3 + $0x180] sm:$0xff]  ;;  %v1559_v53 = vld [vmem:[%s3771_s3 + $0x188] sm:$0xff]  ;;  %v2522_v55 = vpack.c.bf16 %v1527_v50, %v1526_v49 }
  0x44   :  { %2148 = vmatmul.mubr.msk.f32.gmra.mrb[22].mxu1 %vm132_vm0, %v90_v59  ;;  %317 = vmatprep.mubr.f32.mxu0 %v2745_v7  ;;  %v2217_v54 = vld [vmem:[%s3769_s1 + $0x340] sm:$0xff]  ;;  %v2219_v56 = vld [vmem:[%s3769_s1 + $0x350] sm:$0xff]  ;;  %v2554_v57 = vpack.c.bf16 %v1559_v53, %v1558_v52  ;;  %v32_v58 = vld [vmem:[%s3768_s0 + $0x38] sm:$0xff] }
  0x45   :  { %478 = vmatprep.mubr.f32.mxu1 %v2745_v7  ;;  %v33_v59 = vld [vmem:[%s3768_s0 + $0x48] sm:$0xff]  ;;  %v38_v0 = vld [vmem:[%s3768_s0 + $0x80] sm:$0xff]  ;;  %v39_v1 = vld [vmem:[%s3768_s0 + $0x90] sm:$0xff] }
  0x46   :  { %v40_v2 = vld [vmem:[%s3768_s0 + $0x98] sm:$0xff]  ;;  %v41_v3 = vld [vmem:[%s3768_s0 + $0xa8] sm:$0xff]  ;;  %v42_v4 = vld [vmem:[%s3768_s0 + $0xb0] sm:$0xff] }
  0x47   :  { %2133 = vmatmul.mubr.msk.f32.gmra.mrb[24].mxu0 %vm132_vm0, %v91_v60  ;;  %v1510_v5 = vld [vmem:[%s3771_s3] sm:$0xff]  ;;  %v1543_v9 = vld [vmem:[%s3771_s3 + $0x108] sm:$0xff]  ;;  %v1528_v10 = vld [vmem:[%s3771_s3 + $0x90] sm:$0xff] }
  0x48   :  { %2149 = vmatmul.mubr.msk.f32.gmra.mrb[24].mxu1 %vm132_vm0, %v91_v60  ;;  %323 = vmatprep.mubr.f32.mxu0 %v2745_v7  ;;  %v34_v60 = vld [vmem:[%s3768_s0 + $0x50] sm:$0xff]  ;;  %v1561_v14 = vld [vmem:[%s3771_s3 + $0x198] sm:$0xff]  ;;  %v1562_v26 = vld [vmem:[%s3771_s3 + $0x1a0] sm:$0xff] }
  0x49   :  { %484 = vmatprep.mubr.f32.mxu1 %v2745_v7  ;;  %v1560_v13 = vld [vmem:[%s3771_s3 + $0x190] sm:$0xff]  ;;  %v1513_v19 = vld [vmem:[%s3771_s3 + $0x18] sm:$0xff]  ;;  %v1563_v27 = vld [vmem:[%s3771_s3 + $0x1a8] sm:$0xff] }
  0x4a   :  { %v1512_v18 = vld [vmem:[%s3771_s3 + $0x10] sm:$0xff]  ;;  %v2558_v21 = vpack.c.bf16 %v1561_v14, %v1560_v13  ;;  %v1545_v22 = vld [vmem:[%s3771_s3 + $0x118] sm:$0xff]  ;;  %v1514_v31 = vld [vmem:[%s3771_s3 + $0x20] sm:$0xff]  ;;  %v2562_v34 = vpack.c.bf16 %v1563_v27, %v1562_v26 }
  0x4b   :  { %2134 = vmatmul.mubr.msk.f32.gmra.mrb[26].mxu0 %vm132_vm0, %v92_v61  ;;  %v2528_v28 = vpack.c.bf16 %v1513_v19, %v1512_v18  ;;  %v1515_v32 = vld [vmem:[%s3771_s3 + $0x28] sm:$0xff]  ;;  %v1564_v39 = vld [vmem:[%s3771_s3 + $0x1b0] sm:$0xff]  ;;  %v1565_v40 = vld [vmem:[%s3771_s3 + $0x1b8] sm:$0xff] }
  0x4c   :  { %2150 = vmatmul.mubr.msk.f32.gmra.mrb[26].mxu1 %vm132_vm0, %v92_v61  ;;  %329 = vmatprep.mubr.f32.mxu0 %v2745_v7  ;;  %v35_v61 = vld [vmem:[%s3768_s0 + $0x60] sm:$0xff]  ;;  %v1547_v35 = vld [vmem:[%s3771_s3 + $0x128] sm:$0xff]  ;;  %v1541_v26 = vld [vmem:[%s3771_s3 + $0xf8] sm:$0xff] }
  0x4d   :  { %490 = vmatprep.mubr.f32.mxu1 %v2745_v7  ;;  %v1534_v49 = vld [vmem:[%s3771_s3 + $0xc0] sm:$0xff]  ;;  %v1535_v50 = vld [vmem:[%s3771_s3 + $0xc8] sm:$0xff] }
  0x4e   :  { %v1566_v52 = vld [vmem:[%s3771_s3 + $0x1c0] sm:$0xff]  ;;  %v1567_v53 = vld [vmem:[%s3771_s3 + $0x1c8] sm:$0xff] }
  0x4f   :  { %2135 = vmatmul.mubr.msk.f32.gmra.mrb[28].mxu0 %vm132_vm0, %v93_v62  ;;  %v1539_v13 = vld [vmem:[%s3771_s3 + $0xe8] sm:$0xff]  ;;  %v878_v14 = vld [vmem:[%s3768_s0 + $0x3a] sm:$0xff] }
  0x50   :  { %2151 = vmatmul.mubr.msk.f32.gmra.mrb[28].mxu1 %vm132_vm0, %v93_v62  ;;  %335 = vmatprep.mubr.f32.mxu0 %v2745_v7  ;;  %v36_v62 = vld [vmem:[%s3768_s0 + $0x68] sm:$0xff] }
  0x51   :  { %496 = vmatprep.mubr.f32.mxu1 %v2745_v7  ;;  %v879_v27 = vld [vmem:[%s3768_s0 + $0x4a] sm:$0xff] }
  0x53   :  { %2136 = vmatmul.mubr.msk.f32.gmra.mrb[30].mxu0 %vm132_vm0, %v94_v63 }
  0x54   :  { %2152 = vmatmul.mubr.msk.f32.gmra.mrb[30].mxu1 %vm132_vm0, %v94_v63  ;;  %615 = vmatprep.mubr.f32.mxu0 %v2745_v7  ;;  %v37_v63 = vld [vmem:[%s3768_s0 + $0x78] sm:$0xff] }
  0x55   :  { %776 = vmatprep.mubr.f32.mxu1 %v2745_v7 }
  0x57   :  { %2153 = vmatmul.mubr.msk.f32.vlgmr.msra.gmra.mrb[0].mxu0 %vm132_vm0, %v27_v6 }
  0x58   :  { %2169 = vmatmul.mubr.msk.f32.vlgmr.msra.gmra.mrb[0].mxu1 %vm132_vm0, %v27_v6  ;;  %2493 = vmatpush1.bf16.msra.mxu0 %v2492_v8  ;;  %v1511_v6 = vld [vmem:[%s3771_s3 + $0x8] sm:$0xff]  ;;  %v1542_v8 = vld [vmem:[%s3771_s3 + $0x100] sm:$0xff] }
  0x59   :  { %2509 = vmatpush1.bf16.msra.mxu1 %v2508_v11  ;;  %621 = vmatprep.mubr.f32.mxu0 %v2745_v7  ;;  %v1529_v11 = vld [vmem:[%s3771_s3 + $0x98] sm:$0xff]  ;;  %v2524_v15 = vpack.c.bf16 %v1511_v6, %v1510_v5  ;;  %v1520_v6 = vld [vmem:[%s3771_s3 + $0x50] sm:$0xff] }
  0x5a   :  { %782 = vmatprep.mubr.f32.mxu1 %v2745_v7  ;;  %2495 = vmatprep.subr.bf16.mxu0 %v2494_v12  ;;  %v873_v12 = vld [vmem:[%s3768_s0 + $0x2] sm:$0xff]  ;;  %v2526_v17 = vpack.c.bf16 %v1529_v11, %v1528_v10  ;;  %v1553_v11 = vld [vmem:[%s3771_s3 + $0x158] sm:$0xff] }
  0x5b   :  { %2154 = vmatmul.mubr.msk.f32.gmra.mrb[2].mxu0 %vm132_vm0, %v28_v20  ;;  %2511 = vmatprep.subr.bf16.mxu1 %v2510_v16  ;;  %v2556_v16 = vpack.c.bf16 %v1543_v9, %v1542_v8  ;;  %v1521_v8 = vld [vmem:[%s3771_s3 + $0x58] sm:$0xff]  ;;  %v1552_v9 = vld [vmem:[%s3771_s3 + $0x150] sm:$0xff] }
  0x5c   :  { %2170 = vmatmul.mubr.msk.f32.gmra.mrb[2].mxu1 %vm132_vm0, %v28_v20  ;;  %627 = vmatprep.mubr.f32.mxu0 %v2745_v7  ;;  %v1544_v20 = vld [vmem:[%s3771_s3 + $0x110] sm:$0xff]  ;;  %v2576_v18 = vpack.c.bf16 %v1553_v11, %v1552_v9 }
  0x5d   :  { %788 = vmatprep.mubr.f32.mxu1 %v2745_v7  ;;  %2497 = vmatpush1.bf16.msra.mxu0 %v2496_v23  ;;  %v1530_v23 = vld [vmem:[%s3771_s3 + $0xa0] sm:$0xff] }
  0x5e   :  { %2513 = vmatpush1.bf16.msra.mxu1 %v2512_v24  ;;  %2499 = vmatprep.subr.bf16.mxu0 %v2498_v25  ;;  %v1531_v24 = vld [vmem:[%s3771_s3 + $0xa8] sm:$0xff] }
  0x5f   :  { %2155 = vmatmul.mubr.msk.f32.gmra.mrb[4].mxu0 %vm132_vm0, %v29_v33  ;;  %2515 = vmatprep.subr.bf16.mxu1 %v2514_v29  ;;  %v874_v25 = vld [vmem:[%s3768_s0 + $0xa] sm:$0xff]  ;;  %v2560_v29 = vpack.c.bf16 %v1545_v22, %v1544_v20  ;;  %v2530_v30 = vpack.c.bf16 %v1531_v24, %v1530_v23  ;;  %v1522_v20 = vld [vmem:[%s3771_s3 + $0x60] sm:$0xff] }
  0x60   :  { %2171 = vmatmul.mubr.msk.f32.gmra.mrb[4].mxu1 %vm132_vm0, %v29_v33  ;;  %633 = vmatprep.mubr.f32.mxu0 %v2745_v7  ;;  %v1546_v33 = vld [vmem:[%s3771_s3 + $0x120] sm:$0xff]  ;;  %v1555_v24 = vld [vmem:[%s3771_s3 + $0x168] sm:$0xff] }
  0x61   :  { %794 = vmatprep.mubr.f32.mxu1 %v2745_v7  ;;  %2501 = vmatpush1.bf16.msra.mxu0 %v2500_v36  ;;  %v1532_v36 = vld [vmem:[%s3771_s3 + $0xb0] sm:$0xff]  ;;  %v2564_v42 = vpack.c.bf16 %v1547_v35, %v1546_v33  ;;  %v1554_v22 = vld [vmem:[%s3771_s3 + $0x160] sm:$0xff] }
  0x62   :  { %2517 = vmatpush1.bf16.msra.mxu1 %v2516_v37  ;;  %2503 = vmatprep.subr.bf16.mxu0 %v2502_v38  ;;  %v1533_v37 = vld [vmem:[%s3771_s3 + $0xb8] sm:$0xff]  ;;  %v881_v35 = vld [vmem:[%s3768_s0 + $0x62] sm:$0xff] }
  0x63   :  { %2156 = vmatmul.mubr.msk.f32.gmra.mrb[6].mxu0 %vm132_vm0, %v30_v44  ;;  %2519 = vmatprep.subr.bf16.mxu1 %v2518_v41  ;;  %v875_v38 = vld [vmem:[%s3768_s0 + $0x1a] sm:$0xff]  ;;  %v2532_v41 = vpack.c.bf16 %v1515_v32, %v1514_v31  ;;  %v2534_v43 = vpack.c.bf16 %v1533_v37, %v1532_v36  ;;  %v2580_v31 = vpack.c.bf16 %v1555_v24, %v1554_v22  ;;  %v882_v36 = vld [vmem:[%s3768_s0 + $0x6a] sm:$0xff] }
  0x64   :  { %2172 = vmatmul.mubr.msk.f32.gmra.mrb[6].mxu1 %vm132_vm0, %v30_v44  ;;  %639 = vmatprep.mubr.f32.mxu0 %v2745_v7  ;;  %v1516_v44 = vld [vmem:[%s3771_s3 + $0x30] sm:$0xff]  ;;  %v883_v37 = vld [vmem:[%s3768_s0 + $0x7a] sm:$0xff] }
  0x65   :  { %800 = vmatprep.mubr.f32.mxu1 %v2745_v7  ;;  %2505 = vmatpush1.bf16.msra.mxu0 %v2504_v45  ;;  %v1517_v45 = vld [vmem:[%s3771_s3 + $0x38] sm:$0xff] }
  0x66   :  { %2521 = vmatpush1.bf16.msra.mxu1 %v2520_v47  ;;  %990 = vmatprep.subr.mxu0 %v2218_v48  ;;  %v2566_v47 = vpack.c.bf16 %v1565_v40, %v1564_v39  ;;  %v1549_v48 = vld [vmem:[%s3771_s3 + $0x138] sm:$0xff] }
  0x67   :  { %2157 = vmatmul.mubr.msk.f32.gmra.mrb[8].mxu0 %vm132_vm0, %v31_v46  ;;  %1151 = vmatprep.subr.mxu1 %v2220_v51  ;;  %v876_v51 = vld [vmem:[%s3768_s0 + $0x22] sm:$0xff]  ;;  %v885_v39 = vld [vmem:[%s3768_s0 + $0x92] sm:$0xff]  ;;  %v886_v40 = vld [vmem:[%s3768_s0 + $0x9a] sm:$0xff] }
  0x68   :  { %2173 = vmatmul.mubr.msk.f32.gmra.mrb[8].mxu1 %vm132_vm0, %v31_v46  ;;  %645 = vmatprep.mubr.f32.mxu0 %v2745_v7  ;;  %v1548_v46 = vld [vmem:[%s3771_s3 + $0x130] sm:$0xff] }
  0x69   :  { %806 = vmatprep.mubr.f32.mxu1 %v2745_v7  ;;  %991 = vmatpush1.msra.mxu0 %v2217_v54  ;;  %v2536_v54 = vpack.c.bf16 %v1517_v45, %v1516_v44  ;;  %v1525_v44 = vld [vmem:[%s3771_s3 + $0x78] sm:$0xff]  ;;  %v1556_v45 = vld [vmem:[%s3771_s3 + $0x170] sm:$0xff] }
  0x6a   :  { %1152 = vmatpush1.msra.mxu1 %v2219_v56  ;;  %2523 = vmatprep.subr.bf16.mxu0 %v2522_v55  ;;  %v2568_v55 = vpack.c.bf16 %v1549_v48, %v1548_v46  ;;  %v2538_v56 = vpack.c.bf16 %v1535_v50, %v1534_v49  ;;  %v1362_v49 = vlaneseq }
  0x6b   :  { %2158 = vmatmul.mubr.msk.f32.gmra.mrb[10].mxu0 %vm132_vm0, %v32_v58  ;;  %2555 = vmatprep.subr.bf16.mxu1 %v2554_v57  ;;  %v1518_v57 = vld [vmem:[%s3771_s3 + $0x40] sm:$0xff] }
  0x6c   :  { %2174 = vmatmul.mubr.msk.f32.gmra.mrb[10].mxu1 %vm132_vm0, %v32_v58  ;;  %651 = vmatprep.mubr.f32.mxu0 %v2745_v7  ;;  %v1519_v58 = vld [vmem:[%s3771_s3 + $0x48] sm:$0xff]  ;;  %v1363_v50 = vshrl.u32 %v1362_v49, 7 }
  0x6d   :  { %812 = vmatprep.mubr.f32.mxu1 %v2745_v7 }
  0x6f   :  { %2159 = vmatmul.mubr.msk.f32.gmra.mrb[12].mxu0 %vm132_vm0, %v33_v59 }
  0x70   :  { %2175 = vmatmul.mubr.msk.f32.gmra.mrb[12].mxu1 %vm132_vm0, %v33_v59  ;;  %657 = vmatprep.mubr.f32.mxu0 %v2745_v7  ;;  %v1550_v59 = vld [vmem:[%s3771_s3 + $0x140] sm:$0xff] }
  0x71   :  { %818 = vmatprep.mubr.f32.mxu1 %v2745_v7 }
  0x73   :  { %2160 = vmatmul.mubr.msk.f32.gmra.mrb[14].mxu0 %vm132_vm0, %v34_v60 }
  0x74   :  { %2176 = vmatmul.mubr.msk.f32.gmra.mrb[14].mxu1 %vm132_vm0, %v34_v60  ;;  %663 = vmatprep.mubr.f32.mxu0 %v2745_v7  ;;  %v2570_v60 = vpack.c.bf16 %v1567_v53, %v1566_v52  ;;  %v1360_v52 = vld [vmem:[%s3770_s2] sm:$0xf]  ;;  %v1372_v53 = vsub.s32 2, %v1363_v50 }
  0x75   :  { %824 = vmatprep.mubr.f32.mxu1 %v2745_v7 }
  0x77   :  { %2161 = vmatmul.mubr.msk.f32.gmra.mrb[16].mxu0 %vm132_vm0, %v35_v61 }
  0x78   :  { %2177 = vmatmul.mubr.msk.f32.gmra.mrb[16].mxu1 %vm132_vm0, %v35_v61  ;;  %669 = vmatprep.mubr.f32.mxu0 %v2745_v7  ;;  %v1551_v61 = vld [vmem:[%s3771_s3 + $0x148] sm:$0xff] }
  0x79   :  { %830 = vmatprep.mubr.f32.mxu1 %v2745_v7 }
  0x7b   :  { %2162 = vmatmul.mubr.msk.f32.gmra.mrb[18].mxu0 %vm132_vm0, %v36_v62 }
  0x7c   :  { %2178 = vmatmul.mubr.msk.f32.gmra.mrb[18].mxu1 %vm132_vm0, %v36_v62  ;;  %675 = vmatprep.mubr.f32.mxu0 %v2745_v7  ;;  %v1536_v62 = vld [vmem:[%s3771_s3 + $0xd0] sm:$0xff] }
  0x7d   :  { %836 = vmatprep.mubr.f32.mxu1 %v2745_v7 }
  0x7f   :  { %2163 = vmatmul.mubr.msk.f32.gmra.mrb[20].mxu0 %vm132_vm0, %v37_v63 }
  0x80   :  { %2179 = vmatmul.mubr.msk.f32.gmra.mrb[20].mxu1 %vm132_vm0, %v37_v63  ;;  %681 = vmatprep.mubr.f32.mxu0 %v2745_v7  ;;  %v1537_v63 = vld [vmem:[%s3771_s3 + $0xd8] sm:$0xff] }
  0x81   :  { %842 = vmatprep.mubr.f32.mxu1 %v2745_v7  ;;  %v2542_v5 = vpack.c.bf16 %v1537_v63, %v1536_v62 }
  0x83   :  { %2164 = vmatmul.mubr.msk.f32.gmra.mrb[22].mxu0 %vm132_vm0, %v38_v0 }
  0x84   :  { %2180 = vmatmul.mubr.msk.f32.gmra.mrb[22].mxu1 %vm132_vm0, %v38_v0  ;;  %687 = vmatprep.mubr.f32.mxu0 %v2745_v7  ;;  %v877_v0 = vld [vmem:[%s3768_s0 + $0x32] sm:$0xff] }
  0x85   :  { %848 = vmatprep.mubr.f32.mxu1 %v2745_v7 }
  0x87   :  { %2165 = vmatmul.mubr.msk.f32.gmra.mrb[24].mxu0 %vm132_vm0, %v39_v1 }
  0x88   :  { %2181 = vmatmul.mubr.msk.f32.gmra.mrb[24].mxu1 %vm132_vm0, %v39_v1  ;;  %693 = vmatprep.mubr.f32.mxu0 %v2745_v7  ;;  %v1568_v1 = vld [vmem:[%s3771_s3 + $0x1d0] sm:$0xff] }
  0x89   :  { %854 = vmatprep.mubr.f32.mxu1 %v2745_v7 }
  0x8b   :  { %2166 = vmatmul.mubr.msk.f32.gmra.mrb[26].mxu0 %vm132_vm0, %v40_v2 }
  0x8c   :  { %2182 = vmatmul.mubr.msk.f32.gmra.mrb[26].mxu1 %vm132_vm0, %v40_v2  ;;  %699 = vmatprep.mubr.f32.mxu0 %v2745_v7  ;;  %v1569_v2 = vld [vmem:[%s3771_s3 + $0x1d8] sm:$0xff] }
  0x8d   :  { %860 = vmatprep.mubr.f32.mxu1 %v2745_v7  ;;  %v2574_v10 = vpack.c.bf16 %v1569_v2, %v1568_v1 }
  0x8f   :  { %2167 = vmatmul.mubr.msk.f32.gmra.mrb[28].mxu0 %vm132_vm0, %v41_v3 }
  0x90   :  { %2183 = vmatmul.mubr.msk.f32.gmra.mrb[28].mxu1 %vm132_vm0, %v41_v3  ;;  %705 = vmatprep.mubr.f32.mxu0 %v2745_v7  ;;  %v2540_v3 = vpack.c.bf16 %v1519_v58, %v1518_v57  ;;  %v3646_v57 = vrot.slane %v1360_v52, %v1372_v53 }
  0x91   :  { %866 = vmatprep.mubr.f32.mxu1 %v2745_v7 }
  0x93   :  { %2168 = vmatmul.mubr.msk.f32.gmra.mrb[30].mxu0 %vm132_vm0, %v42_v4 }
  0x94   :  { %2184 = vmatmul.mubr.msk.f32.gmra.mrb[30].mxu1 %vm132_vm0, %v42_v4  ;;  %1038 = vmatprep.mubr.f32.mxu0 %v2745_v7  ;;  %v2572_v4 = vpack.c.bf16 %v1551_v61, %v1550_v59 }
  0x95   :  { %1199 = vmatprep.mubr.f32.mxu1 %v2745_v7 }
  0x97   :  { %2221 = vmatmul.mubr.msk.f32.vlgmr.msra.gmra.mrb[0].mxu0 %vm132_vm0, %v873_v12 }
  0x98   :  { %2237 = vmatmul.mubr.msk.f32.vlgmr.msra.gmra.mrb[0].mxu1 %vm132_vm0, %v873_v12  ;;  %1044 = vmatprep.mubr.f32.mxu0 %v2745_v7  ;;  %v1538_v12 = vld [vmem:[%s3771_s3 + $0xe0] sm:$0xff] }
  0x99   :  { %1205 = vmatprep.mubr.f32.mxu1 %v2745_v7  ;;  %2525 = vmatpush3.bf16.msra.mxu0 %v2524_v15  ;;  %v1570_v15 = vld [vmem:[%s3771_s3 + $0x1e0] sm:$0xff]  ;;  %v2546_v19 = vpack.c.bf16 %v1539_v13, %v1538_v12 }
  0x9a   :  { %2557 = vmatpush3.bf16.msra.mxu1 %v2556_v16  ;;  %2527 = vmatprep.subr.bf16.mxu0 %v2526_v17  ;;  %v1571_v16 = vld [vmem:[%s3771_s3 + $0x1e8] sm:$0xff]  ;;  %v2544_v17 = vpack.c.bf16 %v1521_v8, %v1520_v6 }
  0x9b   :  { %2222 = vmatmul.mubr.msk.f32.gmra.mrb[2].mxu0 %vm132_vm0, %v874_v25  ;;  %2559 = vmatprep.subr.bf16.mxu1 %v2558_v21  ;;  %v1523_v21 = vld [vmem:[%s3771_s3 + $0x68] sm:$0xff]  ;;  %v2578_v23 = vpack.c.bf16 %v1571_v16, %v1570_v15 }
  0x9c   :  { %2238 = vmatmul.mubr.msk.f32.gmra.mrb[2].mxu1 %vm132_vm0, %v874_v25  ;;  %1050 = vmatprep.mubr.f32.mxu0 %v2745_v7  ;;  %v1540_v25 = vld [vmem:[%s3771_s3 + $0xf0] sm:$0xff] }
  0x9d   :  { %1211 = vmatprep.mubr.f32.mxu1 %v2745_v7  ;;  %2529 = vmatpush3.bf16.msra.mxu0 %v2528_v28  ;;  %v1572_v28 = vld [vmem:[%s3771_s3 + $0x1f0] sm:$0xff]  ;;  %v2550_v32 = vpack.c.bf16 %v1541_v26, %v1540_v25 }
  0x9e   :  { %2561 = vmatpush3.bf16.msra.mxu1 %v2560_v29  ;;  %2531 = vmatprep.subr.bf16.mxu0 %v2530_v30  ;;  %v1573_v29 = vld [vmem:[%s3771_s3 + $0x1f8] sm:$0xff]  ;;  %v2548_v30 = vpack.c.bf16 %v1523_v21, %v1522_v20 }
  0x9f   :  { %2223 = vmatmul.mubr.msk.f32.gmra.mrb[4].mxu0 %vm132_vm0, %v875_v38  ;;  %2563 = vmatprep.subr.bf16.mxu1 %v2562_v34  ;;  %v2582_v33 = vpack.c.bf16 %v1573_v29, %v1572_v28  ;;  %v880_v34 = vld [vmem:[%s3768_s0 + $0x52] sm:$0xff] }
  0xa0   :  { %2239 = vmatmul.mubr.msk.f32.gmra.mrb[4].mxu1 %vm132_vm0, %v875_v38  ;;  %1056 = vmatprep.mubr.f32.mxu0 %v2745_v7  ;;  %v884_v38 = vld [vmem:[%s3768_s0 + $0x82] sm:$0xff] }
  0xa1   :  { %1217 = vmatprep.mubr.f32.mxu1 %v2745_v7  ;;  %2533 = vmatpush3.bf16.msra.mxu0 %v2532_v41  ;;  %v887_v41 = vld [vmem:[%s3768_s0 + $0xaa] sm:$0xff] }
  0xa2   :  { %2565 = vmatpush3.bf16.msra.mxu1 %v2564_v42  ;;  %2535 = vmatprep.subr.bf16.mxu0 %v2534_v43  ;;  %v888_v42 = vld [vmem:[%s3768_s0 + $0xb2] sm:$0xff] }
  0xa3   :  { %2224 = vmatmul.mubr.msk.f32.gmra.mrb[6].mxu0 %vm132_vm0, %v876_v51  ;;  %2567 = vmatprep.subr.bf16.mxu1 %v2566_v47  ;;  %v1524_v43 = vld [vmem:[%s3771_s3 + $0x70] sm:$0xff]  ;;  %v1557_v47 = vld [vmem:[%s3771_s3 + $0x178] sm:$0xff] }
  0xa4   :  { %2240 = vmatmul.mubr.msk.f32.gmra.mrb[6].mxu1 %vm132_vm0, %v876_v51  ;;  %1062 = vmatprep.mubr.f32.mxu0 %v2745_v7  ;;  %v2552_v46 = vpack.c.bf16 %v1525_v44, %v1524_v43  ;;  %v2584_v48 = vpack.c.bf16 %v1557_v47, %v1556_v45  ;;  %v1364_v51 = vsub.s32 0, %v1363_v50 }
  0xa5   :  { %1223 = vmatprep.mubr.f32.mxu1 %v2745_v7  ;;  %2537 = vmatpush3.bf16.msra.mxu0 %v2536_v54  ;;  %v1368_v54 = vsub.s32 1, %v1363_v50 }
  0xa6   :  { %2569 = vmatpush3.bf16.msra.mxu1 %v2568_v55  ;;  %2539 = vmatprep.subr.bf16.mxu0 %v2538_v56  ;;  %v1376_v55 = vsub.s32 3, %v1363_v50  ;;  %v3644_v56 = vrot.slane %v1360_v52, %v1364_v51 }
  0xa7   :  { %2225 = vmatmul.mubr.msk.f32.gmra.mrb[8].mxu0 %vm132_vm0, %v877_v0  ;;  %2571 = vmatprep.subr.bf16.mxu1 %v2570_v60  ;;  %v3648_v58 = vrot.slane %v1360_v52, %v1368_v54 }
  0xa8   :  { %2241 = vmatmul.mubr.msk.f32.gmra.mrb[8].mxu1 %vm132_vm0, %v877_v0  ;;  %1068 = vmatprep.mubr.f32.mxu0 %v2745_v7  ;;  %v3650_v59 = vrot.slane %v1360_v52, %v1376_v55 }
  0xa9   :  { %1229 = vmatprep.mubr.f32.mxu1 %v2745_v7  ;;  %2541 = vmatpush3.bf16.msra.mxu0 %v2540_v3 }
  0xaa   :  { %2573 = vmatpush3.bf16.msra.mxu1 %v2572_v4  ;;  %2543 = vmatprep.subr.bf16.mxu0 %v2542_v5 }
  0xab   :  { %2226 = vmatmul.mubr.msk.f32.gmra.mrb[10].mxu0 %vm132_vm0, %v878_v14  ;;  %2575 = vmatprep.subr.bf16.mxu1 %v2574_v10 }
  0xac   :  { %2242 = vmatmul.mubr.msk.f32.gmra.mrb[10].mxu1 %vm132_vm0, %v878_v14  ;;  %1074 = vmatprep.mubr.f32.mxu0 %v2745_v7 }
  0xad   :  { %1235 = vmatprep.mubr.f32.mxu1 %v2745_v7  ;;  %2545 = vmatpush3.bf16.msra.mxu0 %v2544_v17 }
  0xae   :  { %2577 = vmatpush3.bf16.msra.mxu1 %v2576_v18  ;;  %2547 = vmatprep.subr.bf16.mxu0 %v2546_v19 }
  0xaf   :  { %2227 = vmatmul.mubr.msk.f32.gmra.mrb[12].mxu0 %vm132_vm0, %v879_v27  ;;  %2579 = vmatprep.subr.bf16.mxu1 %v2578_v23 }
  0xb0   :  { %2243 = vmatmul.mubr.msk.f32.gmra.mrb[12].mxu1 %vm132_vm0, %v879_v27  ;;  %1080 = vmatprep.mubr.f32.mxu0 %v2745_v7 }
  0xb1   :  { %1241 = vmatprep.mubr.f32.mxu1 %v2745_v7  ;;  %2549 = vmatpush3.bf16.msra.mxu0 %v2548_v30 }
  0xb2   :  { %2581 = vmatpush3.bf16.msra.mxu1 %v2580_v31  ;;  %2551 = vmatprep.subr.bf16.mxu0 %v2550_v32 }
  0xb3   :  { %2228 = vmatmul.mubr.msk.f32.gmra.mrb[14].mxu0 %vm132_vm0, %v880_v34  ;;  %2583 = vmatprep.subr.bf16.mxu1 %v2582_v33 }
  0xb4   :  { %2244 = vmatmul.mubr.msk.f32.gmra.mrb[14].mxu1 %vm132_vm0, %v880_v34  ;;  %1086 = vmatprep.mubr.f32.mxu0 %v2745_v7 }
  0xb5   :  { %1247 = vmatprep.mubr.f32.mxu1 %v2745_v7  ;;  %2553 = vmatpush3.bf16.msra.mxu0 %v2552_v46 }
  0xb6   :  { %2585 = vmatpush3.bf16.msra.mxu1 %v2584_v48 }
  0xb7   :  { %2229 = vmatmul.mubr.msk.f32.gmra.mrb[16].mxu0 %vm132_vm0, %v881_v35 }
  0xb8   :  { %2245 = vmatmul.mubr.msk.f32.gmra.mrb[16].mxu1 %vm132_vm0, %v881_v35  ;;  %1092 = vmatprep.mubr.f32.mxu0 %v2745_v7 }
  0xb9   :  { %1253 = vmatprep.mubr.f32.mxu1 %v2745_v7 }
  0xbb   :  { %2230 = vmatmul.mubr.msk.f32.gmra.mrb[18].mxu0 %vm132_vm0, %v882_v36 }
  0xbc   :  { %2246 = vmatmul.mubr.msk.f32.gmra.mrb[18].mxu1 %vm132_vm0, %v882_v36  ;;  %1098 = vmatprep.mubr.f32.mxu0 %v2745_v7 }
  0xbd   :  { %1259 = vmatprep.mubr.f32.mxu1 %v2745_v7 }
  0xbf   :  { %2231 = vmatmul.mubr.msk.f32.gmra.mrb[20].mxu0 %vm132_vm0, %v883_v37 }
  0xc0   :  { %2247 = vmatmul.mubr.msk.f32.gmra.mrb[20].mxu1 %vm132_vm0, %v883_v37  ;;  %1104 = vmatprep.mubr.f32.mxu0 %v2745_v7 }
  0xc1   :  { %1265 = vmatprep.mubr.f32.mxu1 %v2745_v7 }
  0xc3   :  { %2232 = vmatmul.mubr.msk.f32.gmra.mrb[22].mxu0 %vm132_vm0, %v884_v38 }
  0xc4   :  { %2248 = vmatmul.mubr.msk.f32.gmra.mrb[22].mxu1 %vm132_vm0, %v884_v38  ;;  %1110 = vmatprep.mubr.f32.mxu0 %v2745_v7 }
  0xc5   :  { %1271 = vmatprep.mubr.f32.mxu1 %v2745_v7 }
  0xc7   :  { %2233 = vmatmul.mubr.msk.f32.gmra.mrb[24].mxu0 %vm132_vm0, %v885_v39 }
  0xc8   :  { %2249 = vmatmul.mubr.msk.f32.gmra.mrb[24].mxu1 %vm132_vm0, %v885_v39  ;;  %1116 = vmatprep.mubr.f32.mxu0 %v2745_v7 }
  0xc9   :  { %1277 = vmatprep.mubr.f32.mxu1 %v2745_v7 }
  0xcb   :  { %2234 = vmatmul.mubr.msk.f32.gmra.mrb[26].mxu0 %vm132_vm0, %v886_v40 }
  0xcc   :  { %2250 = vmatmul.mubr.msk.f32.gmra.mrb[26].mxu1 %vm132_vm0, %v886_v40  ;;  %1122 = vmatprep.mubr.f32.mxu0 %v2745_v7 }
  0xcd   :  { %1283 = vmatprep.mubr.f32.mxu1 %v2745_v7 }
  0xcf   :  { %2235 = vmatmul.mubr.msk.f32.gmra.mrb[28].mxu0 %vm132_vm0, %v887_v41 }
  0xd0   :  { %2251 = vmatmul.mubr.msk.f32.gmra.mrb[28].mxu1 %vm132_vm0, %v887_v41  ;;  %1128 = vmatprep.mubr.f32.mxu0 %v2745_v7 }
  0xd1   :  { %1289 = vmatprep.mubr.f32.mxu1 %v2745_v7 }
  0xd3   :  { %2236 = vmatmul.mubr.msk.f32.gmra.mrb[30].mxu0 %vm132_vm0, %v888_v42 }
  0xd4   :  { %2252 = vmatmul.mubr.msk.f32.gmra.mrb[30].mxu1 %vm132_vm0, %v888_v42 }
 0x16a   :  { %v1040_v60 = vpop.f32.mrb[0].mxu0 }
 0x16b   :  { %v1382_v61 = vadd.f32 %v3644_v56, %v1040_v60  ;;  %v1201_v62 = vpop.f32.mrb[0].mxu1  ;;  %v1042_v63 = vpop.f32.mrb[1].mxu0 }
 0x16c   :  { %v1384_v0 = vadd.f32 %v3646_v57, %v1201_v62  ;;  %v1383_v1 = vadd.f32 %v3648_v58, %v1042_v63  ;;  %v1203_v2 = vpop.f32.mrb[1].mxu1 }
 0x16d   :  { %v1385_v3 = vadd.f32 %v3650_v59, %v1203_v2  ;;  %v1446_v6 = vmax.f32 %v1382_v61, 0.0 }
 0x16e   :  { %v1447_v4 = vmax.f32 %v1383_v1, 0.0  ;;  %v1046_v5 = vpop.f32.mrb[2].mxu0  ;;  %v1448_v12 = vmax.f32 %v1384_v0, 0.0 }
 0x16f   :  { %v1449_v8 = vmax.f32 %v1385_v3, 0.0  ;;  %v1386_v9 = vadd.f32 %v3644_v56, %v1046_v5  ;;  %v1207_v10 = vpop.f32.mrb[2].mxu1  ;;  %v1048_v11 = vpop.f32.mrb[3].mxu0 }
 0x170   :  { %v1388_v13 = vadd.f32 %v3646_v57, %v1207_v10  ;;  %v1387_v14 = vadd.f32 %v3648_v58, %v1048_v11  ;;  %v1209_v15 = vpop.f32.mrb[3].mxu1  ;;  %1638 = vmatprep.mubr.f32.mxu0 %v1447_v4 }
 0x171   :  { %v1389_v16 = vadd.f32 %v3650_v59, %v1209_v15  ;;  %1783 = vmatprep.mubr.f32.mxu1 %v1449_v8  ;;  %1639 = vmatmul.mubr.f32.vlgmr.msra.gmra.mrb[32].mxu0 %v1446_v6  ;;  %v1450_v19 = vmax.f32 %v1386_v9, 0.0 }
 0x172   :  { %v1451_v17 = vmax.f32 %v1387_v14, 0.0  ;;  %1784 = vmatmul.mubr.f32.vlgmr.msra.gmra.mrb[32].mxu1 %v1448_v12  ;;  %v1052_v18 = vpop.f32.mrb[4].mxu0  ;;  %v1452_v24 = vmax.f32 %v1388_v13, 0.0 }
 0x173   :  { %v1453_v20 = vmax.f32 %v1389_v16, 0.0  ;;  %v1390_v21 = vadd.f32 %v3644_v56, %v1052_v18  ;;  %v1213_v22 = vpop.f32.mrb[4].mxu1  ;;  %v1054_v23 = vpop.f32.mrb[5].mxu0 }
 0x174   :  { %v1392_v25 = vadd.f32 %v3646_v57, %v1213_v22  ;;  %v1391_v26 = vadd.f32 %v3648_v58, %v1054_v23  ;;  %v1215_v27 = vpop.f32.mrb[5].mxu1  ;;  %1643 = vmatprep.mubr.f32.mxu0 %v1451_v17 }
 0x175   :  { %v1393_v28 = vadd.f32 %v3650_v59, %v1215_v27  ;;  %1788 = vmatprep.mubr.f32.mxu1 %v1453_v20  ;;  %1644 = vmatmul.mubr.f32.gmra.mrb[34].mxu0 %v1450_v19  ;;  %v1454_v31 = vmax.f32 %v1390_v21, 0.0 }
 0x176   :  { %v1455_v29 = vmax.f32 %v1391_v26, 0.0  ;;  %1789 = vmatmul.mubr.f32.gmra.mrb[34].mxu1 %v1452_v24  ;;  %v1058_v30 = vpop.f32.mrb[6].mxu0  ;;  %v1456_v36 = vmax.f32 %v1392_v25, 0.0 }
 0x177   :  { %v1457_v32 = vmax.f32 %v1393_v28, 0.0  ;;  %v1394_v33 = vadd.f32 %v3644_v56, %v1058_v30  ;;  %v1219_v34 = vpop.f32.mrb[6].mxu1  ;;  %v1060_v35 = vpop.f32.mrb[7].mxu0 }
 0x178   :  { %v1396_v37 = vadd.f32 %v3646_v57, %v1219_v34  ;;  %v1395_v38 = vadd.f32 %v3648_v58, %v1060_v35  ;;  %v1221_v39 = vpop.f32.mrb[7].mxu1  ;;  %1648 = vmatprep.mubr.f32.mxu0 %v1455_v29 }
 0x179   :  { %v1397_v40 = vadd.f32 %v3650_v59, %v1221_v39  ;;  %1793 = vmatprep.mubr.f32.mxu1 %v1457_v32  ;;  %1649 = vmatmul.mubr.f32.gmra.mrb[36].mxu0 %v1454_v31  ;;  %v1458_v43 = vmax.f32 %v1394_v33, 0.0 }
 0x17a   :  { %v1459_v41 = vmax.f32 %v1395_v38, 0.0  ;;  %1794 = vmatmul.mubr.f32.gmra.mrb[36].mxu1 %v1456_v36  ;;  %v1064_v42 = vpop.f32.mrb[8].mxu0  ;;  %v1460_v48 = vmax.f32 %v1396_v37, 0.0 }
 0x17b   :  { %v1461_v44 = vmax.f32 %v1397_v40, 0.0  ;;  %v1398_v45 = vadd.f32 %v3644_v56, %v1064_v42  ;;  %v1225_v46 = vpop.f32.mrb[8].mxu1  ;;  %v1066_v47 = vpop.f32.mrb[9].mxu0 }
 0x17c   :  { %v1400_v49 = vadd.f32 %v3646_v57, %v1225_v46  ;;  %v1399_v50 = vadd.f32 %v3648_v58, %v1066_v47  ;;  %v1227_v51 = vpop.f32.mrb[9].mxu1  ;;  %1653 = vmatprep.mubr.f32.mxu0 %v1459_v41 }
 0x17d   :  { %v1401_v52 = vadd.f32 %v3650_v59, %v1227_v51  ;;  %1798 = vmatprep.mubr.f32.mxu1 %v1461_v44  ;;  %1654 = vmatmul.mubr.f32.gmra.mrb[38].mxu0 %v1458_v43  ;;  %v1462_v55 = vmax.f32 %v1398_v45, 0.0 }
 0x17e   :  { %v1463_v53 = vmax.f32 %v1399_v50, 0.0  ;;  %1799 = vmatmul.mubr.f32.gmra.mrb[38].mxu1 %v1460_v48  ;;  %v1070_v54 = vpop.f32.mrb[10].mxu0  ;;  %v1464_v0 = vmax.f32 %v1400_v49, 0.0 }
 0x17f   :  { %v1465_v60 = vmax.f32 %v1401_v52, 0.0  ;;  %v1402_v61 = vadd.f32 %v3644_v56, %v1070_v54  ;;  %v1231_v62 = vpop.f32.mrb[10].mxu1  ;;  %v1072_v63 = vpop.f32.mrb[11].mxu0 }
 0x180   :  { %v1404_v1 = vadd.f32 %v3646_v57, %v1231_v62  ;;  %v1403_v2 = vadd.f32 %v3648_v58, %v1072_v63  ;;  %v1233_v3 = vpop.f32.mrb[11].mxu1  ;;  %1658 = vmatprep.mubr.f32.mxu0 %v1463_v53 }
 0x181   :  { %v1405_v4 = vadd.f32 %v3650_v59, %v1233_v3  ;;  %1803 = vmatprep.mubr.f32.mxu1 %v1465_v60  ;;  %1659 = vmatmul.mubr.f32.gmra.mrb[40].mxu0 %v1462_v55  ;;  %v1466_v8 = vmax.f32 %v1402_v61, 0.0 }
 0x182   :  { %v1467_v5 = vmax.f32 %v1403_v2, 0.0  ;;  %1804 = vmatmul.mubr.f32.gmra.mrb[40].mxu1 %v1464_v0  ;;  %v1076_v6 = vpop.f32.mrb[12].mxu0  ;;  %v1468_v13 = vmax.f32 %v1404_v1, 0.0 }
 0x183   :  { %v1469_v9 = vmax.f32 %v1405_v4, 0.0  ;;  %v1406_v10 = vadd.f32 %v3644_v56, %v1076_v6  ;;  %v1237_v11 = vpop.f32.mrb[12].mxu1  ;;  %v1078_v12 = vpop.f32.mrb[13].mxu0 }
 0x184   :  { %v1408_v14 = vadd.f32 %v3646_v57, %v1237_v11  ;;  %v1407_v15 = vadd.f32 %v3648_v58, %v1078_v12  ;;  %v1239_v16 = vpop.f32.mrb[13].mxu1  ;;  %1663 = vmatprep.mubr.f32.mxu0 %v1467_v5 }
 0x185   :  { %v1409_v17 = vadd.f32 %v3650_v59, %v1239_v16  ;;  %1808 = vmatprep.mubr.f32.mxu1 %v1469_v9  ;;  %1664 = vmatmul.mubr.f32.gmra.mrb[42].mxu0 %v1466_v8  ;;  %v1470_v20 = vmax.f32 %v1406_v10, 0.0 }
 0x186   :  { %v1471_v18 = vmax.f32 %v1407_v15, 0.0  ;;  %1809 = vmatmul.mubr.f32.gmra.mrb[42].mxu1 %v1468_v13  ;;  %v1082_v19 = vpop.f32.mrb[14].mxu0  ;;  %v1472_v25 = vmax.f32 %v1408_v14, 0.0 }
 0x187   :  { %v1473_v21 = vmax.f32 %v1409_v17, 0.0  ;;  %v1410_v22 = vadd.f32 %v3644_v56, %v1082_v19  ;;  %v1243_v23 = vpop.f32.mrb[14].mxu1  ;;  %v1084_v24 = vpop.f32.mrb[15].mxu0 }
 0x188   :  { %v1412_v26 = vadd.f32 %v3646_v57, %v1243_v23  ;;  %v1411_v27 = vadd.f32 %v3648_v58, %v1084_v24  ;;  %v1245_v28 = vpop.f32.mrb[15].mxu1  ;;  %1668 = vmatprep.mubr.f32.mxu0 %v1471_v18 }
 0x189   :  { %v1413_v29 = vadd.f32 %v3650_v59, %v1245_v28  ;;  %1813 = vmatprep.mubr.f32.mxu1 %v1473_v21  ;;  %1669 = vmatmul.mubr.f32.gmra.mrb[44].mxu0 %v1470_v20  ;;  %v1474_v32 = vmax.f32 %v1410_v22, 0.0 }
 0x18a   :  { %v1475_v30 = vmax.f32 %v1411_v27, 0.0  ;;  %1814 = vmatmul.mubr.f32.gmra.mrb[44].mxu1 %v1472_v25  ;;  %v1088_v31 = vpop.f32.mrb[16].mxu0  ;;  %v1476_v37 = vmax.f32 %v1412_v26, 0.0 }
 0x18b   :  { %v1477_v33 = vmax.f32 %v1413_v29, 0.0  ;;  %v1414_v34 = vadd.f32 %v3644_v56, %v1088_v31  ;;  %v1249_v35 = vpop.f32.mrb[16].mxu1  ;;  %v1090_v36 = vpop.f32.mrb[17].mxu0 }
 0x18c   :  { %v1416_v38 = vadd.f32 %v3646_v57, %v1249_v35  ;;  %v1415_v39 = vadd.f32 %v3648_v58, %v1090_v36  ;;  %v1251_v40 = vpop.f32.mrb[17].mxu1  ;;  %1673 = vmatprep.mubr.f32.mxu0 %v1475_v30 }
 0x18d   :  { %v1417_v41 = vadd.f32 %v3650_v59, %v1251_v40  ;;  %1818 = vmatprep.mubr.f32.mxu1 %v1477_v33  ;;  %1674 = vmatmul.mubr.f32.gmra.mrb[46].mxu0 %v1474_v32  ;;  %v1478_v44 = vmax.f32 %v1414_v34, 0.0 }
 0x18e   :  { %v1479_v42 = vmax.f32 %v1415_v39, 0.0  ;;  %1819 = vmatmul.mubr.f32.gmra.mrb[46].mxu1 %v1476_v37  ;;  %v1094_v43 = vpop.f32.mrb[18].mxu0  ;;  %v1480_v49 = vmax.f32 %v1416_v38, 0.0 }
 0x18f   :  { %v1481_v45 = vmax.f32 %v1417_v41, 0.0  ;;  %v1418_v46 = vadd.f32 %v3644_v56, %v1094_v43  ;;  %v1255_v47 = vpop.f32.mrb[18].mxu1  ;;  %v1096_v48 = vpop.f32.mrb[19].mxu0 }
 0x190   :  { %v1420_v50 = vadd.f32 %v3646_v57, %v1255_v47  ;;  %v1419_v51 = vadd.f32 %v3648_v58, %v1096_v48  ;;  %v1257_v52 = vpop.f32.mrb[19].mxu1  ;;  %1678 = vmatprep.mubr.f32.mxu0 %v1479_v42 }
 0x191   :  { %v1421_v53 = vadd.f32 %v3650_v59, %v1257_v52  ;;  %1823 = vmatprep.mubr.f32.mxu1 %v1481_v45  ;;  %1679 = vmatmul.mubr.f32.gmra.mrb[48].mxu0 %v1478_v44  ;;  %v1482_v60 = vmax.f32 %v1418_v46, 0.0 }
 0x192   :  { %v1483_v54 = vmax.f32 %v1419_v51, 0.0  ;;  %1824 = vmatmul.mubr.f32.gmra.mrb[48].mxu1 %v1480_v49  ;;  %v1100_v55 = vpop.f32.mrb[20].mxu0  ;;  %v1484_v1 = vmax.f32 %v1420_v50, 0.0 }
 0x193   :  { %v1485_v61 = vmax.f32 %v1421_v53, 0.0  ;;  %v1422_v62 = vadd.f32 %v3644_v56, %v1100_v55  ;;  %v1261_v63 = vpop.f32.mrb[20].mxu1  ;;  %v1102_v0 = vpop.f32.mrb[21].mxu0 }
 0x194   :  { %v1424_v2 = vadd.f32 %v3646_v57, %v1261_v63  ;;  %v1423_v3 = vadd.f32 %v3648_v58, %v1102_v0  ;;  %v1263_v4 = vpop.f32.mrb[21].mxu1  ;;  %1683 = vmatprep.mubr.f32.mxu0 %v1483_v54 }
 0x195   :  { %v1425_v5 = vadd.f32 %v3650_v59, %v1263_v4  ;;  %1828 = vmatprep.mubr.f32.mxu1 %v1485_v61  ;;  %1684 = vmatmul.mubr.f32.gmra.mrb[50].mxu0 %v1482_v60  ;;  %v1486_v9 = vmax.f32 %v1422_v62, 0.0 }
 0x196   :  { %v1487_v6 = vmax.f32 %v1423_v3, 0.0  ;;  %1829 = vmatmul.mubr.f32.gmra.mrb[50].mxu1 %v1484_v1  ;;  %v1106_v8 = vpop.f32.mrb[22].mxu0  ;;  %v1488_v14 = vmax.f32 %v1424_v2, 0.0 }
 0x197   :  { %v1489_v10 = vmax.f32 %v1425_v5, 0.0  ;;  %v1426_v11 = vadd.f32 %v3644_v56, %v1106_v8  ;;  %v1267_v12 = vpop.f32.mrb[22].mxu1  ;;  %v1108_v13 = vpop.f32.mrb[23].mxu0 }
 0x198   :  { %v1428_v15 = vadd.f32 %v3646_v57, %v1267_v12  ;;  %v1427_v16 = vadd.f32 %v3648_v58, %v1108_v13  ;;  %v1269_v17 = vpop.f32.mrb[23].mxu1  ;;  %1688 = vmatprep.mubr.f32.mxu0 %v1487_v6 }
 0x199   :  { %v1429_v18 = vadd.f32 %v3650_v59, %v1269_v17  ;;  %1833 = vmatprep.mubr.f32.mxu1 %v1489_v10  ;;  %1689 = vmatmul.mubr.f32.gmra.mrb[52].mxu0 %v1486_v9  ;;  %v1490_v21 = vmax.f32 %v1426_v11, 0.0 }
 0x19a   :  { %v1491_v19 = vmax.f32 %v1427_v16, 0.0  ;;  %1834 = vmatmul.mubr.f32.gmra.mrb[52].mxu1 %v1488_v14  ;;  %v1112_v20 = vpop.f32.mrb[24].mxu0  ;;  %v1492_v26 = vmax.f32 %v1428_v15, 0.0 }
 0x19b   :  { %v1493_v22 = vmax.f32 %v1429_v18, 0.0  ;;  %v1430_v23 = vadd.f32 %v3644_v56, %v1112_v20  ;;  %v1273_v24 = vpop.f32.mrb[24].mxu1  ;;  %v1114_v25 = vpop.f32.mrb[25].mxu0 }
 0x19c   :  { %v1432_v27 = vadd.f32 %v3646_v57, %v1273_v24  ;;  %v1431_v28 = vadd.f32 %v3648_v58, %v1114_v25  ;;  %v1275_v29 = vpop.f32.mrb[25].mxu1  ;;  %1693 = vmatprep.mubr.f32.mxu0 %v1491_v19 }
 0x19d   :  { %v1433_v30 = vadd.f32 %v3650_v59, %v1275_v29  ;;  %1838 = vmatprep.mubr.f32.mxu1 %v1493_v22  ;;  %1694 = vmatmul.mubr.f32.gmra.mrb[54].mxu0 %v1490_v21  ;;  %v1494_v33 = vmax.f32 %v1430_v23, 0.0 }
 0x19e   :  { %v1495_v31 = vmax.f32 %v1431_v28, 0.0  ;;  %1839 = vmatmul.mubr.f32.gmra.mrb[54].mxu1 %v1492_v26  ;;  %v1118_v32 = vpop.f32.mrb[26].mxu0  ;;  %v1496_v38 = vmax.f32 %v1432_v27, 0.0 }
 0x19f   :  { %v1497_v34 = vmax.f32 %v1433_v30, 0.0  ;;  %v1434_v35 = vadd.f32 %v3644_v56, %v1118_v32  ;;  %v1279_v36 = vpop.f32.mrb[26].mxu1  ;;  %v1120_v37 = vpop.f32.mrb[27].mxu0 }
 0x1a0   :  { %v1436_v39 = vadd.f32 %v3646_v57, %v1279_v36  ;;  %v1435_v40 = vadd.f32 %v3648_v58, %v1120_v37  ;;  %v1281_v41 = vpop.f32.mrb[27].mxu1  ;;  %1698 = vmatprep.mubr.f32.mxu0 %v1495_v31 }
 0x1a1   :  { %v1437_v42 = vadd.f32 %v3650_v59, %v1281_v41  ;;  %1843 = vmatprep.mubr.f32.mxu1 %v1497_v34  ;;  %1699 = vmatmul.mubr.f32.gmra.mrb[56].mxu0 %v1494_v33  ;;  %v1498_v45 = vmax.f32 %v1434_v35, 0.0 }
 0x1a2   :  { %v1499_v43 = vmax.f32 %v1435_v40, 0.0  ;;  %1844 = vmatmul.mubr.f32.gmra.mrb[56].mxu1 %v1496_v38  ;;  %v1124_v44 = vpop.f32.mrb[28].mxu0  ;;  %v1500_v50 = vmax.f32 %v1436_v39, 0.0 }
 0x1a3   :  { %v1501_v46 = vmax.f32 %v1437_v42, 0.0  ;;  %v1438_v47 = vadd.f32 %v3644_v56, %v1124_v44  ;;  %v1285_v48 = vpop.f32.mrb[28].mxu1  ;;  %v1126_v49 = vpop.f32.mrb[29].mxu0 }
 0x1a4   :  { %v1440_v51 = vadd.f32 %v3646_v57, %v1285_v48  ;;  %v1439_v52 = vadd.f32 %v3648_v58, %v1126_v49  ;;  %v1287_v53 = vpop.f32.mrb[29].mxu1  ;;  %1703 = vmatprep.mubr.f32.mxu0 %v1499_v43 }
 0x1a5   :  { %v1441_v54 = vadd.f32 %v3650_v59, %v1287_v53  ;;  %1848 = vmatprep.mubr.f32.mxu1 %v1501_v46  ;;  %1704 = vmatmul.mubr.f32.gmra.mrb[58].mxu0 %v1498_v45  ;;  %v1502_v61 = vmax.f32 %v1438_v47, 0.0 }
 0x1a6   :  { %v1503_v55 = vmax.f32 %v1439_v52, 0.0  ;;  %1849 = vmatmul.mubr.f32.gmra.mrb[58].mxu1 %v1500_v50  ;;  %v1130_v60 = vpop.f32.mrb[30].mxu0  ;;  %v1504_v2 = vmax.f32 %v1440_v51, 0.0 }
 0x1a7   :  { %v1505_v62 = vmax.f32 %v1441_v54, 0.0  ;;  %v1442_v63 = vadd.f32 %v3644_v56, %v1130_v60  ;;  %v1291_v0 = vpop.f32.mrb[30].mxu1  ;;  %v1132_v1 = vpop.f32.mrb[31].mxu0  ;;  %v1960_v56 = vld [vmem:[%s3773_s5] sm:$0xff] }
 0x1a8   :  { %v1444_v3 = vadd.f32 %v3646_v57, %v1291_v0  ;;  %v1443_v4 = vadd.f32 %v3648_v58, %v1132_v1  ;;  %v1293_v5 = vpop.f32.mrb[31].mxu1  ;;  %1708 = vmatprep.mubr.f32.mxu0 %v1503_v55  ;;  %v1961_v57 = vld [vmem:[%s3773_s5 + $0x8] sm:$0xff]  ;;  %v2746_v58 = vmov 0.0|0.0  }
 0x1a9   :  { %v1445_v6 = vadd.f32 %v3650_v59, %v1293_v5  ;;  %1853 = vmatprep.mubr.f32.mxu1 %v1505_v62  ;;  %1709 = vmatmul.mubr.f32.gmra.mrb[60].mxu0 %v1502_v61  ;;  %v1506_v9 = vmax.f32 %v1442_v63, 0.0  ;;  %v2587_v59 = vpack.c.bf16 %v1961_v57, %v1960_v56 }
 0x1aa   :  { %v1507_v8 = vmax.f32 %v1443_v4, 0.0  ;;  %1854 = vmatmul.mubr.f32.gmra.mrb[60].mxu1 %v1504_v2  ;;  %v1508_v11 = vmax.f32 %v1444_v3, 0.0  ;;  %2586 = vmatprep.subr.bf16.mxu0 %v2746_v58 }
 0x1ab   :  { %v1509_v10 = vmax.f32 %v1445_v6, 0.0  ;;  %2588 = vmatpush3.bf16.msra.mxu0 %v2587_v59 }
 0x1ac   :  { %1713 = vmatprep.mubr.f32.mxu0 %v1507_v8 }
 0x1ad   :  { %1858 = vmatprep.mubr.f32.mxu1 %v1509_v10  ;;  %1714 = vmatmul.mubr.f32.gmra.mrb[62].mxu0 %v1506_v9 }
 0x1ae   :  { %1859 = vmatmul.mubr.f32.gmra.mrb[62].mxu1 %v1508_v11  ;;  %2423 = vmatprep.mubr.msk.f32.mxu0 %vm2747_vm1, %v2745_v7 }
 0x244   :  { %v2288_v12 = vpop.f32.mrb[32].mxu0 }
 0x245   :  { %v2368_v13 = vpop.f32.mrb[32].mxu1  ;;  %v2289_v14 = vpop.f32.mrb[33].mxu0 }
 0x246   :  { %v2290_v15 = vadd.f32 %v2289_v14, %v2288_v12  ;;  %v2369_v16 = vpop.f32.mrb[33].mxu1 }
 0x247   :  { %v2370_v17 = vadd.f32 %v2369_v16, %v2368_v13 }
 0x248   :  { %v2291_v18 = vpop.f32.mrb[34].mxu0 }
 0x249   :  { %v1786_v19 = vadd.f32 %v2370_v17, %v2290_v15  ;;  %v2371_v20 = vpop.f32.mrb[34].mxu1  ;;  %v2292_v21 = vpop.f32.mrb[35].mxu0 }
 0x24a   :  { %v2293_v22 = vadd.f32 %v2292_v21, %v2291_v18  ;;  %v2372_v23 = vpop.f32.mrb[35].mxu1 }
 0x24b   :  { %v2373_v24 = vadd.f32 %v2372_v23, %v2371_v20  ;;  %v1865_v30 = vsel %vm1864_vm2, %v1786_v19, 0.0  ;;  %v3732_v19 = vld [vmem:[%s3772_s4] ss:$0 sm:$0xff] }
 0x24c   :  { %v2294_v25 = vpop.f32.mrb[36].mxu0 }
 0x24d   :  { %v1791_v26 = vadd.f32 %v2373_v24, %v2293_v22  ;;  %v2374_v27 = vpop.f32.mrb[36].mxu1  ;;  %v2295_v28 = vpop.f32.mrb[37].mxu0 }
 0x24e   :  { %v2296_v29 = vadd.f32 %v2295_v28, %v2294_v25  ;;  %v2375_v7 = vpop.f32.mrb[37].mxu1 }
 0x24f   :  { %v1866_v31 = vsel %vm1864_vm2, %v1791_v26, 0.0  ;;  %v2376_v32 = vadd.f32 %v2375_v7, %v2374_v27 }
 0x250   :  { %v1867_v33 = vadd.f32 %v1866_v31, %v1865_v30  ;;  %v2297_v34 = vpop.f32.mrb[38].mxu0 }
 0x251   :  { %v1796_v35 = vadd.f32 %v2376_v32, %v2296_v29  ;;  %v2377_v36 = vpop.f32.mrb[38].mxu1  ;;  %v2298_v37 = vpop.f32.mrb[39].mxu0 }
 0x252   :  { %v1868_v38 = vrot.slane %v1867_v33, 4  ;;  %v2299_v39 = vadd.f32 %v2298_v37, %v2297_v34  ;;  %v2378_v40 = vpop.f32.mrb[39].mxu1 }
 0x253   :  { %v2379_v41 = vadd.f32 %v2378_v40, %v2377_v36  ;;  %v1874_v50 = vsel %vm1864_vm2, %v1796_v35, 0.0 }
 0x254   :  { %v1869_v42 = vadd.f32 %v1868_v38, %v1867_v33  ;;  %v2300_v43 = vpop.f32.mrb[40].mxu0 }
 0x255   :  { %v1801_v44 = vadd.f32 %v2379_v41, %v2299_v39  ;;  %v2380_v45 = vpop.f32.mrb[40].mxu1  ;;  %v2301_v46 = vpop.f32.mrb[41].mxu0 }
 0x256   :  { %v1870_v47 = vrot.slane %v1869_v42, 2  ;;  %v2302_v48 = vadd.f32 %v2301_v46, %v2300_v43  ;;  %v2381_v49 = vpop.f32.mrb[41].mxu1 }
 0x257   :  { %v1875_v51 = vsel %vm1864_vm2, %v1801_v44, 0.0  ;;  %v2382_v52 = vadd.f32 %v2381_v49, %v2380_v45 }
 0x258   :  { %v1876_v53 = vadd.f32 %v1875_v51, %v1874_v50  ;;  %v2303_v54 = vpop.f32.mrb[42].mxu0  ;;  %v1871_v55 = vadd.f32 %v1870_v47, %v1869_v42 }
 0x259   :  { %v1806_v60 = vadd.f32 %v2382_v52, %v2302_v48  ;;  %v2383_v61 = vpop.f32.mrb[42].mxu1  ;;  %v2304_v62 = vpop.f32.mrb[43].mxu0 }
 0x25a   :  { %v1877_v63 = vrot.slane %v1876_v53, 4  ;;  %v2305_v0 = vadd.f32 %v2304_v62, %v2303_v54  ;;  %v2384_v1 = vpop.f32.mrb[43].mxu1  ;;  %v1872_v5 = vrot.slane %v1871_v55, 1 }
 0x25b   :  { %v2385_v2 = vadd.f32 %v2384_v1, %v2383_v61  ;;  %v1883_v57 = vsel %vm1864_vm2, %v1806_v60, 0.0 }
 0x25c   :  { %v1878_v3 = vadd.f32 %v1877_v63, %v1876_v53  ;;  %v2306_v4 = vpop.f32.mrb[44].mxu0  ;;  %v1873_v15 = vadd.f32 %v1872_v5, %v1871_v55 }
 0x25d   :  { %v1811_v6 = vadd.f32 %v2385_v2, %v2305_v0  ;;  %v2386_v8 = vpop.f32.mrb[44].mxu1  ;;  %v2307_v9 = vpop.f32.mrb[45].mxu0 }
 0x25e   :  { %v1879_v10 = vrot.slane %v1878_v3, 2  ;;  %v2308_v11 = vadd.f32 %v2307_v9, %v2306_v4  ;;  %v2387_v56 = vpop.f32.mrb[45].mxu1  ;;  %v1944_v28 = vadd.f32 %v3732_v19, %v1873_v15 }
 0x25f   :  { %v1884_v58 = vsel %vm1864_vm2, %v1811_v6, 0.0  ;;  %v2388_v59 = vadd.f32 %v2387_v56, %v2386_v8 }
 0x260   :  { %v1880_v12 = vadd.f32 %v1879_v10, %v1878_v3  ;;  %v1885_v13 = vadd.f32 %v1884_v58, %v1883_v57  ;;  %v2309_v14 = vpop.f32.mrb[46].mxu0  ;;  %v1952_v42 = vmax.f32 %v1944_v28, 0.0 }
 0x261   :  { %v1816_v16 = vadd.f32 %v2388_v59, %v2308_v11  ;;  %v2389_v17 = vpop.f32.mrb[46].mxu1  ;;  %v2310_v18 = vpop.f32.mrb[47].mxu0 }
 0x262   :  { %v1881_v20 = vrot.slane %v1880_v12, 1  ;;  %v1886_v21 = vrot.slane %v1885_v13, 4  ;;  %v2311_v22 = vadd.f32 %v2310_v18, %v2309_v14  ;;  %v2390_v23 = vpop.f32.mrb[47].mxu1 }
 0x263   :  { %v2391_v24 = vadd.f32 %v2390_v23, %v2389_v17  ;;  %v1892_v35 = vsel %vm1864_vm2, %v1816_v16, 0.0 }
 0x264   :  { %v1882_v25 = vadd.f32 %v1881_v20, %v1880_v12  ;;  %v1887_v26 = vadd.f32 %v1886_v21, %v1885_v13  ;;  %v2312_v27 = vpop.f32.mrb[48].mxu0 }
 0x265   :  { %v1821_v29 = vadd.f32 %v2391_v24, %v2311_v22  ;;  %v2392_v7 = vpop.f32.mrb[48].mxu1  ;;  %v2313_v30 = vpop.f32.mrb[49].mxu0 }
 0x266   :  { %v1945_v31 = vadd.f32 %v3732_v19, %v1882_v25  ;;  %v1888_v32 = vrot.slane %v1887_v26, 2  ;;  %v2314_v33 = vadd.f32 %v2313_v30, %v2312_v27  ;;  %v2393_v34 = vpop.f32.mrb[49].mxu1 }
 0x267   :  { %v1893_v36 = vsel %vm1864_vm2, %v1821_v29, 0.0  ;;  %v2394_v37 = vadd.f32 %v2393_v34, %v2392_v7 }
 0x268   :  { %v1953_v38 = vmax.f32 %v1945_v31, 0.0  ;;  %v1889_v39 = vadd.f32 %v1888_v32, %v1887_v26  ;;  %v1894_v40 = vadd.f32 %v1893_v36, %v1892_v35  ;;  %v2315_v41 = vpop.f32.mrb[50].mxu0 }
 0x269   :  { %v1826_v43 = vadd.f32 %v2394_v37, %v2314_v33  ;;  %v2395_v44 = vpop.f32.mrb[50].mxu1  ;;  %v2316_v45 = vpop.f32.mrb[51].mxu0 }
 0x26a   :  { %v1977_v46 = vrot.slane %v1953_v38, 7  ;;  %v1890_v47 = vrot.slane %v1889_v39, 1  ;;  %v1895_v48 = vrot.slane %v1894_v40, 4  ;;  %v2317_v49 = vadd.f32 %v2316_v45, %v2315_v41  ;;  %v2396_v50 = vpop.f32.mrb[51].mxu1 }
 0x26b   :  { %v2397_v51 = vadd.f32 %v2396_v50, %v2395_v44  ;;  %v1901_v3 = vsel %vm1864_vm2, %v1826_v43, 0.0 }
 0x26c   :  { %v1979_v52 = vsel %vm1978_vm3, %v1977_v46, %v1952_v42  ;;  %v1891_v53 = vadd.f32 %v1890_v47, %v1889_v39  ;;  %v1896_v54 = vadd.f32 %v1895_v48, %v1894_v40  ;;  %v2318_v55 = vpop.f32.mrb[52].mxu0 }
 0x26d   :  { %v1831_v60 = vadd.f32 %v2397_v51, %v2317_v49  ;;  %v2398_v61 = vpop.f32.mrb[52].mxu1  ;;  %v2319_v62 = vpop.f32.mrb[53].mxu0 }
 0x26e   :  { %v1946_v63 = vadd.f32 %v3732_v19, %v1891_v53  ;;  %v1897_v0 = vrot.slane %v1896_v54, 2  ;;  %v2320_v1 = vadd.f32 %v2319_v62, %v2318_v55  ;;  %v2399_v2 = vpop.f32.mrb[53].mxu1 }
 0x26f   :  { %v1902_v4 = vsel %vm1864_vm2, %v1831_v60, 0.0  ;;  %v2400_v5 = vadd.f32 %v2399_v2, %v2398_v61 }
 0x270   :  { %v1954_v6 = vmax.f32 %v1946_v63, 0.0  ;;  %v1898_v8 = vadd.f32 %v1897_v0, %v1896_v54  ;;  %v1903_v9 = vadd.f32 %v1902_v4, %v1901_v3  ;;  %v2321_v10 = vpop.f32.mrb[54].mxu0 }
 0x271   :  { %v1836_v11 = vadd.f32 %v2400_v5, %v2320_v1  ;;  %v2401_v56 = vpop.f32.mrb[54].mxu1  ;;  %v2322_v57 = vpop.f32.mrb[55].mxu0 }
 0x272   :  { %v1980_v58 = vrot.slane %v1954_v6, 6  ;;  %v1899_v59 = vrot.slane %v1898_v8, 1  ;;  %v1904_v12 = vrot.slane %v1903_v9, 4  ;;  %v2323_v13 = vadd.f32 %v2322_v57, %v2321_v10  ;;  %v2402_v14 = vpop.f32.mrb[55].mxu1 }
 0x273   :  { %v2403_v15 = vadd.f32 %v2402_v14, %v2401_v56  ;;  %v1910_v28 = vsel %vm1864_vm2, %v1836_v11, 0.0 }
 0x274   :  { %v1982_v16 = vsel %vm1981_vm4, %v1980_v58, %v1979_v52  ;;  %v1900_v17 = vadd.f32 %v1899_v59, %v1898_v8  ;;  %v1905_v18 = vadd.f32 %v1904_v12, %v1903_v9  ;;  %v2324_v20 = vpop.f32.mrb[56].mxu0 }
 0x275   :  { %v1841_v21 = vadd.f32 %v2403_v15, %v2323_v13  ;;  %v2404_v22 = vpop.f32.mrb[56].mxu1  ;;  %v2325_v23 = vpop.f32.mrb[57].mxu0 }
 0x276   :  { %v1947_v24 = vadd.f32 %v3732_v19, %v1900_v17  ;;  %v1906_v25 = vrot.slane %v1905_v18, 2  ;;  %v2326_v26 = vadd.f32 %v2325_v23, %v2324_v20  ;;  %v2405_v27 = vpop.f32.mrb[57].mxu1 }
 0x277   :  { %v1911_v29 = vsel %vm1864_vm2, %v1841_v21, 0.0  ;;  %v2406_v7 = vadd.f32 %v2405_v27, %v2404_v22 }
 0x278   :  { %v1955_v30 = vmax.f32 %v1947_v24, 0.0  ;;  %v1907_v31 = vadd.f32 %v1906_v25, %v1905_v18  ;;  %v1912_v32 = vadd.f32 %v1911_v29, %v1910_v28  ;;  %v2327_v33 = vpop.f32.mrb[58].mxu0 }
 0x279   :  { %v1846_v34 = vadd.f32 %v2406_v7, %v2326_v26  ;;  %v2407_v35 = vpop.f32.mrb[58].mxu1  ;;  %v2328_v36 = vpop.f32.mrb[59].mxu0 }
 0x27a   :  { %v1983_v37 = vrot.slane %v1955_v30, 5  ;;  %v1908_v38 = vrot.slane %v1907_v31, 1  ;;  %v1913_v39 = vrot.slane %v1912_v32, 4  ;;  %v2329_v40 = vadd.f32 %v2328_v36, %v2327_v33  ;;  %v2408_v41 = vpop.f32.mrb[59].mxu1  ;;  %v2254_v36 = vld [vmem:[%s3774_s6] ss:$0 sm:$0xff] }
 0x27b   :  { %v2409_v42 = vadd.f32 %v2408_v41, %v2407_v35  ;;  %v1919_v54 = vsel %vm1864_vm2, %v1846_v34, 0.0 }
 0x27c   :  { %v1909_v43 = vadd.f32 %v1908_v38, %v1907_v31  ;;  %v1914_v44 = vadd.f32 %v1913_v39, %v1912_v32  ;;  %v2330_v45 = vpop.f32.mrb[60].mxu0  ;;  %v1985_v46 = vsel %vm1984_vm5, %v1983_v37, %v1982_v16 }
 0x27d   :  { %v1851_v47 = vadd.f32 %v2409_v42, %v2329_v40  ;;  %v2410_v48 = vpop.f32.mrb[60].mxu1  ;;  %v2331_v49 = vpop.f32.mrb[61].mxu0 }
 0x27e   :  { %v1948_v50 = vadd.f32 %v3732_v19, %v1909_v43  ;;  %v1915_v51 = vrot.slane %v1914_v44, 2  ;;  %v2332_v52 = vadd.f32 %v2331_v49, %v2330_v45  ;;  %v2411_v53 = vpop.f32.mrb[61].mxu1 }
 0x27f   :  { %v1920_v55 = vsel %vm1864_vm2, %v1851_v47, 0.0  ;;  %v2412_v60 = vadd.f32 %v2411_v53, %v2410_v48 }
 0x280   :  { %v1956_v61 = vmax.f32 %v1948_v50, 0.0  ;;  %v1916_v62 = vadd.f32 %v1915_v51, %v1914_v44  ;;  %v1921_v63 = vadd.f32 %v1920_v55, %v1919_v54  ;;  %v2333_v0 = vpop.f32.mrb[62].mxu0 }
 0x281   :  { %v1856_v1 = vadd.f32 %v2412_v60, %v2332_v52  ;;  %v2413_v2 = vpop.f32.mrb[62].mxu1  ;;  %v2334_v3 = vpop.f32.mrb[63].mxu0 }
 0x282   :  { %v1986_v4 = vrot.slane %v1956_v61, 4  ;;  %v1917_v5 = vrot.slane %v1916_v62, 1  ;;  %v1922_v6 = vrot.slane %v1921_v63, 4  ;;  %v2335_v8 = vadd.f32 %v2334_v3, %v2333_v0  ;;  %v2414_v9 = vpop.f32.mrb[63].mxu1 }
 0x283   :  { %v2415_v10 = vadd.f32 %v2414_v9, %v2413_v2  ;;  %v1928_v13 = vsel %vm1864_vm2, %v1856_v1, 0.0 }
 0x284   :  { %v1918_v11 = vadd.f32 %v1917_v5, %v1916_v62  ;;  %v1923_v56 = vadd.f32 %v1922_v6, %v1921_v63  ;;  %v1988_v57 = vsel %vm1987_vm6, %v1986_v4, %v1985_v46 }
 0x285   :  { %v1861_v58 = vadd.f32 %v2415_v10, %v2335_v8 }
 0x286   :  { %v1949_v59 = vadd.f32 %v3732_v19, %v1918_v11  ;;  %v1924_v12 = vrot.slane %v1923_v56, 2 }
 0x287   :  { %v1929_v14 = vsel %vm1864_vm2, %v1861_v58, 0.0 }
 0x288   :  { %v1957_v15 = vmax.f32 %v1949_v59, 0.0  ;;  %v1925_v16 = vadd.f32 %v1924_v12, %v1923_v56  ;;  %v1930_v17 = vadd.f32 %v1929_v14, %v1928_v13 }
 0x28a   :  { %v1989_v18 = vrot.slane %v1957_v15, 3  ;;  %v1926_v20 = vrot.slane %v1925_v16, 1  ;;  %v1931_v21 = vrot.slane %v1930_v17, 4 }
 0x28c   :  { %v1927_v22 = vadd.f32 %v1926_v20, %v1925_v16  ;;  %v1932_v23 = vadd.f32 %v1931_v21, %v1930_v17  ;;  %v1991_v24 = vsel %vm1990_vm7, %v1989_v18, %v1988_v57 }
 0x28e   :  { %v1950_v25 = vadd.f32 %v3732_v19, %v1927_v22  ;;  %v1933_v26 = vrot.slane %v1932_v23, 2 }
 0x290   :  { %v1958_v27 = vmax.f32 %v1950_v25, 0.0  ;;  %v1934_v28 = vadd.f32 %v1933_v26, %v1932_v23 }
 0x292   :  { %v1992_v29 = vrot.slane %v1958_v27, 2  ;;  %v1935_v7 = vrot.slane %v1934_v28, 1 }
 0x294   :  { %v1936_v30 = vadd.f32 %v1935_v7, %v1934_v28  ;;  %v1994_v31 = vsel %vm1993_vm8, %v1992_v29, %v1991_v24 }
 0x296   :  { %v1951_v32 = vadd.f32 %v3732_v19, %v1936_v30 }
 0x298   :  { %v1959_v33 = vmax.f32 %v1951_v32, 0.0 }
 0x29a   :  { %v1995_v34 = vrot.slane %v1959_v33, 1 }
 0x29c   :  { %v1997_v35 = vsel %vm1996_vm9, %v1995_v34, %v1994_v31 }
 0x29d   :  { %2424 = vmatmul.mubr.msk.f32.vlgmr.msra.gmra.mrb[64].mxu0 %vm1864_vm2, %v1997_v35 }
 0x370   :  { %v2066_v37 = vpop.f32.mrb[64].mxu0 }
 0x371   :  { %v2067_v38 = vadd.f32 %v2254_v36, %v2066_v37  ;;  %v2425_v39 = vpop.f32.mrb[65].mxu0 }
 0x373   :  { %2070 = vst [vmem:[#allocation2] sm:$0xff] %v2067_v38 }
 0x374   :  { %2732 = shalt.err (!%p2729_p4)
}
 0x375   :  { %s2733_s29 = scalar_lea.hbm %s3775_s7, 128 }
 0x376   :  { %p2734_p5 = scmp.ne.s32.totalorder %s3775_s7, %s2733_s29  ;;  %p2737_p6 = scmp.lt.u32.totalorder %s2733_s29, %s3775_s7 }
 0x378   :  { %p2739_p7 = pnand %p2737_p6, %p2734_p5 }
 0x37a   :  { %2742 = shalt.err (!%p2739_p7)
}
 0x37b   :  { %2080 = dma.vmem_to_hbm [thread:$0]  %s2078_s25, 128, %s3775_s7, [#allocation3]  }
 0x37c   :  { %2743 = dma.done.wait [#allocation3], 128  }
 0x37d   :  { %2744 = vsyncadd [#allocation3], 4294967168 }
 0x37e   :  { %2084 = vsyncpa [#allocation3], 1 }

</bundles_post_ra>
